<compile_context>
chip_gen: v7x
topology: tpu7x:2x2x1
jax: 0.10.0
libtpu: 0.0.40
codegen_flags: <defaults>
</compile_context>

<pallas_src>
import numpy as np
import jax
import jax.numpy as jnp
from jax import lax
from jax.experimental import pallas as pl
from jax.experimental.pallas import tpu as pltpu

# ----------------------- small synthetic config ------------------------------
VOCAB = 50          # vocab_size
EMB = 32            # embed_size
HID = 32            # utt_cell_size (GRU hidden, unidirectional)
KEY = 32            # attention key size (== utt_cell_size in LAVA)
BS_SIZE = 12        # corpus.bs_size
DB_SIZE = 6         # corpus.db_size
Y_SIZE = 16         # config.y_size
MAX_ACTION = 5.0    # config.max_action
PAD_ID = 0          # PAD token id (nn.Embedding padding_idx=0)


def _sigmoid(x):
    return 1.0 / (1.0 + jnp.exp(-x))


# ------------------------------ fused kernel ----------------------------------
def actor_kernel(tok_ref, bs_ref, db_ref,
                 tok2wi_ref, bi_ref, wh_ref, bh_ref,
                 wk_ref, bk_ref, wq_ref, bq_ref,
                 whead_bs_ref, whead_db_ref, whead_sum_ref, bhead_ref,
                 z_ref, mu_ref, lv_ref):
    """Embedding (one-hot matmul) + GRU + masked attention + Gaussian heads.

    tok_ref     : [T*B, 1] int32  tokens in t-major order (row = t*B + b)
    bs_ref      : [B, BS]  db_ref : [B, DB]
    tok2wi_ref  : [V, 3H]  = emb_table @ [W_ir|W_iz|W_in]   (pre-fused)
    bi/bh_ref   : [1, 3H]  fused GRU biases; wh_ref : [H, 3H] fused hidden weights
    wk/bk       : attention key Linear; wq/bq : attention query Linear
    whead_*     : Hidden2Gaussian weight, block-split along cat([bs, db, summary])
    outputs     : z, mu, logvar  each [B, Y]
    """
    TB = tok_ref.shape[0]
    B = bs_ref.shape[0]
    T = TB // B
    H = wh_ref.shape[0]
    V = tok2wi_ref.shape[0]
    Y = mu_ref.shape[1]

    tok = tok_ref[...]                                                 # [T*B, 1]
    onehot = (tok == lax.broadcasted_iota(jnp.int32, (TB, V), 1)).astype(jnp.float32)
    # x_t @ [W_ir|W_iz|W_in] + b_i for every timestep, as ONE MXU matmul.
    xw = jnp.dot(onehot, tok2wi_ref[...],
                 preferred_element_type=jnp.float32) + bi_ref[...]     # [T*B, 3H]

    wh = wh_ref[...]
    bh = bh_ref[...]
    h = jnp.zeros((B, H), jnp.float32)
    outs = []
    for t in range(T):                         # static unroll (T small & fixed)
        x = xw[t * B:(t + 1) * B, :]           # [B, 3H]  static aligned slice
        hw = jnp.dot(h, wh, preferred_element_type=jnp.float32) + bh   # [B, 3H]
        r = _sigmoid(x[:, :H] + hw[:, :H])
        zg = _sigmoid(x[:, H:2 * H] + hw[:, H:2 * H])
        n = jnp.tanh(x[:, 2 * H:] + r * hw[:, 2 * H:])
        h = (1.0 - zg) * n + zg * h
        outs.append(h)

    # Attention logits for all timesteps at once (hoisted out of the recurrence).
    outs2d = jnp.concatenate(outs, axis=0)                             # [T*B, H]
    fc1 = jnp.tanh(jnp.dot(outs2d, wk_ref[...],
                           preferred_element_type=jnp.float32) + bk_ref[...])
    score = jnp.sum(fc1 * wq_ref[...], axis=-1, keepdims=True) + bq_ref[...]   # [T*B, 1]
    maskf = (tok != PAD_ID).astype(jnp.float32)                                # [T*B, 1]

    # Re-lay scores / mask lane-dense as [B, T]; softmax becomes a lane reduce.
    lane_t = lax.broadcasted_iota(jnp.int32, (B, T), 1)
    score_bt = jnp.zeros((B, T), jnp.float32)
    mask_bt = jnp.zeros((B, T), jnp.float32)
    for t in range(T):
        score_bt = jnp.where(lane_t == t, score[t * B:(t + 1) * B, :], score_bt)
        mask_bt = jnp.where(lane_t == t, maskf[t * B:(t + 1) * B, :], mask_bt)

    m = jnp.max(score_bt, axis=-1, keepdims=True)
    e = jnp.exp(score_bt - m)
    attn = e / jnp.sum(e, axis=-1, keepdims=True)          # softmax over time
    attn = attn * mask_bt                                  # mask PAD positions
    attn = attn / (jnp.sum(attn, axis=-1, keepdims=True) + 1e-10)

    summary = jnp.zeros((B, H), jnp.float32)
    for t in range(T):
        summary = summary + attn[:, t:t + 1] * outs[t]     # [B, H]

    # Hidden2Gaussian heads on cat([bs, db, summary]) via block-split matmuls
    # (mu and logvar heads fused into one [D, 2Y] matrix, split by lane slice).
    head = (jnp.dot(bs_ref[...], whead_bs_ref[...], preferred_element_type=jnp.float32)
            + jnp.dot(db_ref[...], whead_db_ref[...], preferred_element_type=jnp.float32)
            + jnp.dot(summary, whead_sum_ref[...], preferred_element_type=jnp.float32)
            + bhead_ref[...])                              # [B, 2Y]
    mu = head[:, :Y]
    lv = head[:, Y:]
    mu_ref[...] = mu
    lv_ref[...] = lv
    z_ref[...] = MAX_ACTION * jnp.tanh(mu)


# ------------------------------ wrapper ---------------------------------------
def prepare_kernel_params(p):
    """One-time weight fusion / transposition (NOT done per forward)."""
    wi = jnp.concatenate([p['w_ir'].T, p['w_iz'].T, p['w_in'].T], axis=1)   # [E, 3H]
    wh = jnp.concatenate([p['w_hr'].T, p['w_hz'].T, p['w_hn'].T], axis=1)   # [H, 3H]
    bi = jnp.concatenate([p['b_ir'], p['b_iz'], p['b_in']])[None, :]        # [1, 3H]
    bh = jnp.concatenate([p['b_hr'], p['b_hz'], p['b_hn']])[None, :]        # [1, 3H]
    tok2wi = jnp.dot(p['emb_table'], wi)                                    # [V, 3H]
    w_head = jnp.concatenate([p['w_mu'].T, p['w_logvar'].T], axis=1)        # [D, 2Y]
    b_head = jnp.concatenate([p['b_mu'], p['b_logvar']])[None, :]           # [1, 2Y]
    return dict(
        tok2wi=tok2wi, bi=bi, wh=wh, bh=bh,
        wk=p['w_key'].T, bk=p['b_key'][None, :],
        wq=p['w_query'], bq=p['b_query'][None, :],
        whead_bs=w_head[:BS_SIZE],
        whead_db=w_head[BS_SIZE:BS_SIZE + DB_SIZE],
        whead_sum=w_head[BS_SIZE + DB_SIZE:],
        bhead=b_head,
    )


@jax.jit
def deterministic_gaussian_actor_forward(kparams, contexts, bs, db):
    """contexts: [B, T] int32 token ids; bs: [B, BS_SIZE]; db: [B, DB_SIZE]."""
    B, T = contexts.shape
    # Only remaining host glue: lay the 64 int32 tokens out t-major as a column.
    tok_col = contexts.T.reshape(T * B, 1).astype(jnp.int32)

    vmem = pl.BlockSpec(memory_space=pltpu.MemorySpace.VMEM)
    inputs = [tok_col, bs.astype(jnp.float32), db.astype(jnp.float32),
              kparams['tok2wi'], kparams['bi'], kparams['wh'], kparams['bh'],
              kparams['wk'], kparams['bk'], kparams['wq'], kparams['bq'],
              kparams['whead_bs'], kparams['whead_db'], kparams['whead_sum'],
              kparams['bhead']]

    z, mu, logvar = pl.pallas_call(
        actor_kernel,
        out_shape=(jax.ShapeDtypeStruct((B, Y_SIZE), jnp.float32),
                   jax.ShapeDtypeStruct((B, Y_SIZE), jnp.float32),
                   jax.ShapeDtypeStruct((B, Y_SIZE), jnp.float32)),
        in_specs=[vmem] * len(inputs),
        out_specs=(vmem, vmem, vmem),
    )(*inputs)
    return z, mu, logvar


# ------------------------- pure-JAX reference ----------------------------------
def reference_forward(params, contexts, bs, db):
    emb = params['emb_table'][contexts].astype(jnp.float32)           # [B, T, E]
    mask = (contexts != PAD_ID).astype(jnp.float32)                   # [B, T]
    B = contexts.shape[0]

    def step(h, x_t):
        r = jax.nn.sigmoid(x_t @ params['w_ir'].T + params['b_ir']
                           + h @ params['w_hr'].T + params['b_hr'])
        zg = jax.nn.sigmoid(x_t @ params['w_iz'].T + params['b_iz']
                            + h @ params['w_hz'].T + params['b_hz'])
        n = jnp.tanh(x_t @ params['w_in'].T + params['b_in']
                     + r * (h @ params['w_hn'].T + params['b_hn']))
        h_new = (1.0 - zg) * n + zg * h
        return h_new, h_new

    h0 = jnp.zeros((B, HID), jnp.float32)
    _, outs = lax.scan(step, h0, jnp.transpose(emb, (1, 0, 2)))        # [T, B, H]
    fc1 = jnp.tanh(outs @ params['w_key'].T + params['b_key'])         # [T, B, K]
    sc = (fc1 @ params['w_query'].T + params['b_query'])[..., 0]       # [T, B]
    attn = jax.nn.softmax(sc, axis=0)
    attn = attn * mask.T
    attn = attn / (jnp.sum(attn, axis=0, keepdims=True) + 1e-10)
    summary = jnp.sum(attn[:, :, None] * outs, axis=0)                 # [B, H]
    enc_last = jnp.concatenate([bs, db, summary], axis=1)
    mu = enc_last @ params['w_mu'].T + params['b_mu']
    logvar = enc_last @ params['w_logvar'].T + params['b_logvar']
    z = MAX_ACTION * jnp.tanh(mu)
    return z, mu, logvar


# ------------------------------ params ----------------------------------------
def init_params(key):
    ks = jax.random.split(key, 22)

    def lin(k, shape, scale=0.1):
        return (scale * jax.random.normal(k, shape)).astype(jnp.float32)

    emb_table = lin(ks[0], (VOCAB, EMB))
    emb_table = emb_table.at[PAD_ID].set(0.0)     # nn.Embedding padding_idx=0
    D = BS_SIZE + DB_SIZE + HID
    return dict(
        emb_table=emb_table,
        # GRU (PyTorch gate order r, z, n; split into separate matrices)
        w_ir=lin(ks[1], (HID, EMB)), w_iz=lin(ks[2], (HID, EMB)), w_in=lin(ks[3], (HID, EMB)),
        w_hr=lin(ks[4], (HID, HID)), w_hz=lin(ks[5], (HID, HID)), w_hn=lin(ks[6], (HID, HID)),
        b_ir=lin(ks[7], (HID,)), b_iz=lin(ks[8], (HID,)), b_in=lin(ks[9], (HID,)),
        b_hr=lin(ks[10], (HID,)), b_hz=lin(ks[11], (HID,)), b_hn=lin(ks[12], (HID,)),
        # attention pooling
        w_key=lin(ks[13], (KEY, HID)), b_key=lin(ks[14], (KEY,)),
        w_query=lin(ks[15], (1, KEY)), b_query=lin(ks[16], (1,)),
        # Hidden2Gaussian heads
        w_mu=lin(ks[17], (Y_SIZE, D)), b_mu=lin(ks[18], (Y_SIZE,)),
        w_logvar=lin(ks[19], (Y_SIZE, D)), b_logvar=lin(ks[20], (Y_SIZE,)),
    )


# -------------------------------- main -----------------------------------------
if __name__ == "__main__":
    key = jax.random.PRNGKey(0)
    kp, kc, kbs, kdb = jax.random.split(key, 4)
    params = init_params(kp)
    kparams = prepare_kernel_params(params)     # one-time fusion, reused across calls

    B, T = 8, 8
    tokens = jax.random.randint(kc, (B, T), 1, VOCAB).astype(jnp.int32)
    # pad the tails of some rows to exercise the attention mask
    lens = jnp.array([8, 6, 5, 8, 3, 8, 7, 4])[:, None]
    tokens = jnp.where(jnp.arange(T)[None, :] < lens, tokens, PAD_ID)
    bs = jax.random.uniform(kbs, (B, BS_SIZE), dtype=jnp.float32)
    db = jax.random.uniform(kdb, (B, DB_SIZE), dtype=jnp.float32)

    z, mu, logvar = deterministic_gaussian_actor_forward(kparams, tokens, bs, db)
    jax.block_until_ready((z, mu, logvar))

    z_r, mu_r, lv_r = reference_forward(params, tokens, bs, db)
    np.testing.assert_allclose(np.asarray(mu), np.asarray(mu_r), atol=2e-3, rtol=2e-3)
    np.testing.assert_allclose(np.asarray(logvar), np.asarray(lv_r), atol=2e-3, rtol=2e-3)
    np.testing.assert_allclose(np.asarray(z), np.asarray(z_r), atol=2e-3, rtol=2e-3)

    print("KERNEL_OK")
</pallas_src>

<mosaic_0001>
module attributes {stable_mosaic.version = 11 : i64} {
  func.func @actor_kernel(%arg0: memref<64x1xi32, #tpu.memory_space<vmem>>, %arg1: memref<8x12xf32, #tpu.memory_space<vmem>>, %arg2: memref<8x6xf32, #tpu.memory_space<vmem>>, %arg3: memref<50x96xf32, #tpu.memory_space<vmem>>, %arg4: memref<1x96xf32, #tpu.memory_space<vmem>>, %arg5: memref<32x96xf32, #tpu.memory_space<vmem>>, %arg6: memref<1x96xf32, #tpu.memory_space<vmem>>, %arg7: memref<32x32xf32, #tpu.memory_space<vmem>>, %arg8: memref<1x32xf32, #tpu.memory_space<vmem>>, %arg9: memref<1x32xf32, #tpu.memory_space<vmem>>, %arg10: memref<1x1xf32, #tpu.memory_space<vmem>>, %arg11: memref<12x32xf32, #tpu.memory_space<vmem>>, %arg12: memref<6x32xf32, #tpu.memory_space<vmem>>, %arg13: memref<32x32xf32, #tpu.memory_space<vmem>>, %arg14: memref<1x32xf32, #tpu.memory_space<vmem>>, %arg15: memref<8x16xf32, #tpu.memory_space<vmem>>, %arg16: memref<8x16xf32, #tpu.memory_space<vmem>>, %arg17: memref<8x16xf32, #tpu.memory_space<vmem>>) attributes {dimension_semantics = [], scalar_prefetch = 0 : i64, scratch_operands = 0 : i64, tpu.core_type = #tpu.core_type<tc>} {
    %c0 = arith.constant 0 : index
    %c0_0 = arith.constant 0 : index
    %0 = vector.load %arg0[%c0, %c0_0] : memref<64x1xi32, #tpu.memory_space<vmem>>, vector<64x1xi32>
    %1 = tpu.iota {dimensions = array<i32: 1>} : vector<64x50xi32>
    %2 = vector.broadcast %0 : vector<64x1xi32> to vector<64x50xi32>
    %3 = arith.cmpi eq, %2, %1 : vector<64x50xi32>
    %4 = arith.extui %3 : vector<64x50xi1> to vector<64x50xi32>
    %5 = arith.sitofp %4 : vector<64x50xi32> to vector<64x50xf32>
    %c0_1 = arith.constant 0 : index
    %c0_2 = arith.constant 0 : index
    %6 = vector.load %arg3[%c0_1, %c0_2] : memref<50x96xf32, #tpu.memory_space<vmem>>, vector<50x96xf32>
    %cst = arith.constant dense<0.000000e+00> : vector<64x96xf32>
    %7 = tpu.matmul %5, %6, %cst {dimension_numbers = #tpu.dot_dimension_numbers<[1], [0], [0], [1], [0, 0, 1, 1], [], []>} : vector<64x50xf32>, vector<50x96xf32>, vector<64x96xf32> -> vector<64x96xf32>
    %c0_3 = arith.constant 0 : index
    %c0_4 = arith.constant 0 : index
    %8 = vector.load %arg4[%c0_3, %c0_4] : memref<1x96xf32, #tpu.memory_space<vmem>>, vector<1x96xf32>
    %9 = vector.broadcast %8 : vector<1x96xf32> to vector<64x96xf32>
    %10 = arith.addf %7, %9 : vector<64x96xf32>
    %c0_5 = arith.constant 0 : index
    %c0_6 = arith.constant 0 : index
    %11 = vector.load %arg5[%c0_5, %c0_6] : memref<32x96xf32, #tpu.memory_space<vmem>>, vector<32x96xf32>
    %c0_7 = arith.constant 0 : index
    %c0_8 = arith.constant 0 : index
    %12 = vector.load %arg6[%c0_7, %c0_8] : memref<1x96xf32, #tpu.memory_space<vmem>>, vector<1x96xf32>
    %cst_9 = arith.constant 0.000000e+00 : f32
    %13 = vector.broadcast %cst_9 : f32 to vector<8x32xf32>
    %14 = vector.extract_strided_slice %10 {offsets = [0, 0], sizes = [8, 96], strides = [1, 1]} : vector<64x96xf32> to vector<8x96xf32>
    %cst_10 = arith.constant dense<0.000000e+00> : vector<8x96xf32>
    %15 = tpu.matmul %13, %11, %cst_10 {dimension_numbers = #tpu.dot_dimension_numbers<[1], [0], [0], [1], [0, 0, 1, 1], [], []>} : vector<8x32xf32>, vector<32x96xf32>, vector<8x96xf32> -> vector<8x96xf32>
    %16 = vector.broadcast %12 : vector<1x96xf32> to vector<8x96xf32>
    %17 = arith.addf %15, %16 : vector<8x96xf32>
    %18 = vector.extract_strided_slice %14 {offsets = [0, 0], sizes = [8, 32], strides = [1, 1]} : vector<8x96xf32> to vector<8x32xf32>
    %19 = vector.extract_strided_slice %17 {offsets = [0, 0], sizes = [8, 32], strides = [1, 1]} : vector<8x96xf32> to vector<8x32xf32>
    %20 = arith.addf %18, %19 : vector<8x32xf32>
    %cst_11 = arith.constant 0.000000e+00 : f32
    %21 = vector.broadcast %cst_11 : f32 to vector<8x32xf32>
    %22 = arith.subf %21, %20 : vector<8x32xf32>
    %23 = math.exp %22 : vector<8x32xf32>
    %cst_12 = arith.constant 1.000000e+00 : f32
    %24 = vector.broadcast %cst_12 : f32 to vector<8x32xf32>
    %25 = arith.addf %24, %23 : vector<8x32xf32>
    %cst_13 = arith.constant 1.000000e+00 : f32
    %26 = vector.broadcast %cst_13 : f32 to vector<8x32xf32>
    %27 = arith.divf %26, %25 : vector<8x32xf32>
    %28 = vector.extract_strided_slice %14 {offsets = [0, 32], sizes = [8, 32], strides = [1, 1]} : vector<8x96xf32> to vector<8x32xf32>
    %29 = vector.extract_strided_slice %17 {offsets = [0, 32], sizes = [8, 32], strides = [1, 1]} : vector<8x96xf32> to vector<8x32xf32>
    %30 = arith.addf %28, %29 : vector<8x32xf32>
    %cst_14 = arith.constant 0.000000e+00 : f32
    %31 = vector.broadcast %cst_14 : f32 to vector<8x32xf32>
    %32 = arith.subf %31, %30 : vector<8x32xf32>
    %33 = math.exp %32 : vector<8x32xf32>
    %cst_15 = arith.constant 1.000000e+00 : f32
    %34 = vector.broadcast %cst_15 : f32 to vector<8x32xf32>
    %35 = arith.addf %34, %33 : vector<8x32xf32>
    %cst_16 = arith.constant 1.000000e+00 : f32
    %36 = vector.broadcast %cst_16 : f32 to vector<8x32xf32>
    %37 = arith.divf %36, %35 : vector<8x32xf32>
    %38 = vector.extract_strided_slice %14 {offsets = [0, 64], sizes = [8, 32], strides = [1, 1]} : vector<8x96xf32> to vector<8x32xf32>
    %39 = vector.extract_strided_slice %17 {offsets = [0, 64], sizes = [8, 32], strides = [1, 1]} : vector<8x96xf32> to vector<8x32xf32>
    %40 = arith.mulf %27, %39 : vector<8x32xf32>
    %41 = arith.addf %38, %40 : vector<8x32xf32>
    %42 = math.tanh %41 : vector<8x32xf32>
    %cst_17 = arith.constant 1.000000e+00 : f32
    %43 = vector.broadcast %cst_17 : f32 to vector<8x32xf32>
    %44 = arith.subf %43, %37 : vector<8x32xf32>
    %45 = arith.mulf %44, %42 : vector<8x32xf32>
    %46 = arith.mulf %37, %13 : vector<8x32xf32>
    %47 = arith.addf %45, %46 : vector<8x32xf32>
    %48 = vector.extract_strided_slice %10 {offsets = [8, 0], sizes = [8, 96], strides = [1, 1]} : vector<64x96xf32> to vector<8x96xf32>
    %cst_18 = arith.constant dense<0.000000e+00> : vector<8x96xf32>
    %49 = tpu.matmul %47, %11, %cst_18 {dimension_numbers = #tpu.dot_dimension_numbers<[1], [0], [0], [1], [0, 0, 1, 1], [], []>} : vector<8x32xf32>, vector<32x96xf32>, vector<8x96xf32> -> vector<8x96xf32>
    %50 = vector.broadcast %12 : vector<1x96xf32> to vector<8x96xf32>
    %51 = arith.addf %49, %50 : vector<8x96xf32>
    %52 = vector.extract_strided_slice %48 {offsets = [0, 0], sizes = [8, 32], strides = [1, 1]} : vector<8x96xf32> to vector<8x32xf32>
    %53 = vector.extract_strided_slice %51 {offsets = [0, 0], sizes = [8, 32], strides = [1, 1]} : vector<8x96xf32> to vector<8x32xf32>
    %54 = arith.addf %52, %53 : vector<8x32xf32>
    %cst_19 = arith.constant 0.000000e+00 : f32
    %55 = vector.broadcast %cst_19 : f32 to vector<8x32xf32>
    %56 = arith.subf %55, %54 : vector<8x32xf32>
    %57 = math.exp %56 : vector<8x32xf32>
    %cst_20 = arith.constant 1.000000e+00 : f32
    %58 = vector.broadcast %cst_20 : f32 to vector<8x32xf32>
    %59 = arith.addf %58, %57 : vector<8x32xf32>
    %cst_21 = arith.constant 1.000000e+00 : f32
    %60 = vector.broadcast %cst_21 : f32 to vector<8x32xf32>
    %61 = arith.divf %60, %59 : vector<8x32xf32>
    %62 = vector.extract_strided_slice %48 {offsets = [0, 32], sizes = [8, 32], strides = [1, 1]} : vector<8x96xf32> to vector<8x32xf32>
    %63 = vector.extract_strided_slice %51 {offsets = [0, 32], sizes = [8, 32], strides = [1, 1]} : vector<8x96xf32> to vector<8x32xf32>
    %64 = arith.addf %62, %63 : vector<8x32xf32>
    %cst_22 = arith.constant 0.000000e+00 : f32
    %65 = vector.broadcast %cst_22 : f32 to vector<8x32xf32>
    %66 = arith.subf %65, %64 : vector<8x32xf32>
    %67 = math.exp %66 : vector<8x32xf32>
    %cst_23 = arith.constant 1.000000e+00 : f32
    %68 = vector.broadcast %cst_23 : f32 to vector<8x32xf32>
    %69 = arith.addf %68, %67 : vector<8x32xf32>
    %cst_24 = arith.constant 1.000000e+00 : f32
    %70 = vector.broadcast %cst_24 : f32 to vector<8x32xf32>
    %71 = arith.divf %70, %69 : vector<8x32xf32>
    %72 = vector.extract_strided_slice %48 {offsets = [0, 64], sizes = [8, 32], strides = [1, 1]} : vector<8x96xf32> to vector<8x32xf32>
    %73 = vector.extract_strided_slice %51 {offsets = [0, 64], sizes = [8, 32], strides = [1, 1]} : vector<8x96xf32> to vector<8x32xf32>
    %74 = arith.mulf %61, %73 : vector<8x32xf32>
    %75 = arith.addf %72, %74 : vector<8x32xf32>
    %76 = math.tanh %75 : vector<8x32xf32>
    %cst_25 = arith.constant 1.000000e+00 : f32
    %77 = vector.broadcast %cst_25 : f32 to vector<8x32xf32>
    %78 = arith.subf %77, %71 : vector<8x32xf32>
    %79 = arith.mulf %78, %76 : vector<8x32xf32>
    %80 = arith.mulf %71, %47 : vector<8x32xf32>
    %81 = arith.addf %79, %80 : vector<8x32xf32>
    %82 = vector.extract_strided_slice %10 {offsets = [16, 0], sizes = [8, 96], strides = [1, 1]} : vector<64x96xf32> to vector<8x96xf32>
    %cst_26 = arith.constant dense<0.000000e+00> : vector<8x96xf32>
    %83 = tpu.matmul %81, %11, %cst_26 {dimension_numbers = #tpu.dot_dimension_numbers<[1], [0], [0], [1], [0, 0, 1, 1], [], []>} : vector<8x32xf32>, vector<32x96xf32>, vector<8x96xf32> -> vector<8x96xf32>
    %84 = vector.broadcast %12 : vector<1x96xf32> to vector<8x96xf32>
    %85 = arith.addf %83, %84 : vector<8x96xf32>
    %86 = vector.extract_strided_slice %82 {offsets = [0, 0], sizes = [8, 32], strides = [1, 1]} : vector<8x96xf32> to vector<8x32xf32>
    %87 = vector.extract_strided_slice %85 {offsets = [0, 0], sizes = [8, 32], strides = [1, 1]} : vector<8x96xf32> to vector<8x32xf32>
    %88 = arith.addf %86, %87 : vector<8x32xf32>
    %cst_27 = arith.constant 0.000000e+00 : f32
    %89 = vector.broadcast %cst_27 : f32 to vector<8x32xf32>
    %90 = arith.subf %89, %88 : vector<8x32xf32>
    %91 = math.exp %90 : vector<8x32xf32>
    %cst_28 = arith.constant 1.000000e+00 : f32
    %92 = vector.broadcast %cst_28 : f32 to vector<8x32xf32>
    %93 = arith.addf %92, %91 : vector<8x32xf32>
    %cst_29 = arith.constant 1.000000e+00 : f32
    %94 = vector.broadcast %cst_29 : f32 to vector<8x32xf32>
    %95 = arith.divf %94, %93 : vector<8x32xf32>
    %96 = vector.extract_strided_slice %82 {offsets = [0, 32], sizes = [8, 32], strides = [1, 1]} : vector<8x96xf32> to vector<8x32xf32>
    %97 = vector.extract_strided_slice %85 {offsets = [0, 32], sizes = [8, 32], strides = [1, 1]} : vector<8x96xf32> to vector<8x32xf32>
    %98 = arith.addf %96, %97 : vector<8x32xf32>
    %cst_30 = arith.constant 0.000000e+00 : f32
    %99 = vector.broadcast %cst_30 : f32 to vector<8x32xf32>
    %100 = arith.subf %99, %98 : vector<8x32xf32>
    %101 = math.exp %100 : vector<8x32xf32>
    %cst_31 = arith.constant 1.000000e+00 : f32
    %102 = vector.broadcast %cst_31 : f32 to vector<8x32xf32>
    %103 = arith.addf %102, %101 : vector<8x32xf32>
    %cst_32 = arith.constant 1.000000e+00 : f32
    %104 = vector.broadcast %cst_32 : f32 to vector<8x32xf32>
    %105 = arith.divf %104, %103 : vector<8x32xf32>
    %106 = vector.extract_strided_slice %82 {offsets = [0, 64], sizes = [8, 32], strides = [1, 1]} : vector<8x96xf32> to vector<8x32xf32>
    %107 = vector.extract_strided_slice %85 {offsets = [0, 64], sizes = [8, 32], strides = [1, 1]} : vector<8x96xf32> to vector<8x32xf32>
    %108 = arith.mulf %95, %107 : vector<8x32xf32>
    %109 = arith.addf %106, %108 : vector<8x32xf32>
    %110 = math.tanh %109 : vector<8x32xf32>
    %cst_33 = arith.constant 1.000000e+00 : f32
    %111 = vector.broadcast %cst_33 : f32 to vector<8x32xf32>
    %112 = arith.subf %111, %105 : vector<8x32xf32>
    %113 = arith.mulf %112, %110 : vector<8x32xf32>
    %114 = arith.mulf %105, %81 : vector<8x32xf32>
    %115 = arith.addf %113, %114 : vector<8x32xf32>
    %116 = vector.extract_strided_slice %10 {offsets = [24, 0], sizes = [8, 96], strides = [1, 1]} : vector<64x96xf32> to vector<8x96xf32>
    %cst_34 = arith.constant dense<0.000000e+00> : vector<8x96xf32>
    %117 = tpu.matmul %115, %11, %cst_34 {dimension_numbers = #tpu.dot_dimension_numbers<[1], [0], [0], [1], [0, 0, 1, 1], [], []>} : vector<8x32xf32>, vector<32x96xf32>, vector<8x96xf32> -> vector<8x96xf32>
    %118 = vector.broadcast %12 : vector<1x96xf32> to vector<8x96xf32>
    %119 = arith.addf %117, %118 : vector<8x96xf32>
    %120 = vector.extract_strided_slice %116 {offsets = [0, 0], sizes = [8, 32], strides = [1, 1]} : vector<8x96xf32> to vector<8x32xf32>
    %121 = vector.extract_strided_slice %119 {offsets = [0, 0], sizes = [8, 32], strides = [1, 1]} : vector<8x96xf32> to vector<8x32xf32>
    %122 = arith.addf %120, %121 : vector<8x32xf32>
    %cst_35 = arith.constant 0.000000e+00 : f32
    %123 = vector.broadcast %cst_35 : f32 to vector<8x32xf32>
    %124 = arith.subf %123, %122 : vector<8x32xf32>
    %125 = math.exp %124 : vector<8x32xf32>
    %cst_36 = arith.constant 1.000000e+00 : f32
    %126 = vector.broadcast %cst_36 : f32 to vector<8x32xf32>
    %127 = arith.addf %126, %125 : vector<8x32xf32>
    %cst_37 = arith.constant 1.000000e+00 : f32
    %128 = vector.broadcast %cst_37 : f32 to vector<8x32xf32>
    %129 = arith.divf %128, %127 : vector<8x32xf32>
    %130 = vector.extract_strided_slice %116 {offsets = [0, 32], sizes = [8, 32], strides = [1, 1]} : vector<8x96xf32> to vector<8x32xf32>
    %131 = vector.extract_strided_slice %119 {offsets = [0, 32], sizes = [8, 32], strides = [1, 1]} : vector<8x96xf32> to vector<8x32xf32>
    %132 = arith.addf %130, %131 : vector<8x32xf32>
    %cst_38 = arith.constant 0.000000e+00 : f32
    %133 = vector.broadcast %cst_38 : f32 to vector<8x32xf32>
    %134 = arith.subf %133, %132 : vector<8x32xf32>
    %135 = math.exp %134 : vector<8x32xf32>
    %cst_39 = arith.constant 1.000000e+00 : f32
    %136 = vector.broadcast %cst_39 : f32 to vector<8x32xf32>
    %137 = arith.addf %136, %135 : vector<8x32xf32>
    %cst_40 = arith.constant 1.000000e+00 : f32
    %138 = vector.broadcast %cst_40 : f32 to vector<8x32xf32>
    %139 = arith.divf %138, %137 : vector<8x32xf32>
    %140 = vector.extract_strided_slice %116 {offsets = [0, 64], sizes = [8, 32], strides = [1, 1]} : vector<8x96xf32> to vector<8x32xf32>
    %141 = vector.extract_strided_slice %119 {offsets = [0, 64], sizes = [8, 32], strides = [1, 1]} : vector<8x96xf32> to vector<8x32xf32>
    %142 = arith.mulf %129, %141 : vector<8x32xf32>
    %143 = arith.addf %140, %142 : vector<8x32xf32>
    %144 = math.tanh %143 : vector<8x32xf32>
    %cst_41 = arith.constant 1.000000e+00 : f32
    %145 = vector.broadcast %cst_41 : f32 to vector<8x32xf32>
    %146 = arith.subf %145, %139 : vector<8x32xf32>
    %147 = arith.mulf %146, %144 : vector<8x32xf32>
    %148 = arith.mulf %139, %115 : vector<8x32xf32>
    %149 = arith.addf %147, %148 : vector<8x32xf32>
    %150 = vector.extract_strided_slice %10 {offsets = [32, 0], sizes = [8, 96], strides = [1, 1]} : vector<64x96xf32> to vector<8x96xf32>
    %cst_42 = arith.constant dense<0.000000e+00> : vector<8x96xf32>
    %151 = tpu.matmul %149, %11, %cst_42 {dimension_numbers = #tpu.dot_dimension_numbers<[1], [0], [0], [1], [0, 0, 1, 1], [], []>} : vector<8x32xf32>, vector<32x96xf32>, vector<8x96xf32> -> vector<8x96xf32>
    %152 = vector.broadcast %12 : vector<1x96xf32> to vector<8x96xf32>
    %153 = arith.addf %151, %152 : vector<8x96xf32>
    %154 = vector.extract_strided_slice %150 {offsets = [0, 0], sizes = [8, 32], strides = [1, 1]} : vector<8x96xf32> to vector<8x32xf32>
    %155 = vector.extract_strided_slice %153 {offsets = [0, 0], sizes = [8, 32], strides = [1, 1]} : vector<8x96xf32> to vector<8x32xf32>
    %156 = arith.addf %154, %155 : vector<8x32xf32>
    %cst_43 = arith.constant 0.000000e+00 : f32
    %157 = vector.broadcast %cst_43 : f32 to vector<8x32xf32>
    %158 = arith.subf %157, %156 : vector<8x32xf32>
    %159 = math.exp %158 : vector<8x32xf32>
    %cst_44 = arith.constant 1.000000e+00 : f32
    %160 = vector.broadcast %cst_44 : f32 to vector<8x32xf32>
    %161 = arith.addf %160, %159 : vector<8x32xf32>
    %cst_45 = arith.constant 1.000000e+00 : f32
    %162 = vector.broadcast %cst_45 : f32 to vector<8x32xf32>
    %163 = arith.divf %162, %161 : vector<8x32xf32>
    %164 = vector.extract_strided_slice %150 {offsets = [0, 32], sizes = [8, 32], strides = [1, 1]} : vector<8x96xf32> to vector<8x32xf32>
    %165 = vector.extract_strided_slice %153 {offsets = [0, 32], sizes = [8, 32], strides = [1, 1]} : vector<8x96xf32> to vector<8x32xf32>
    %166 = arith.addf %164, %165 : vector<8x32xf32>
    %cst_46 = arith.constant 0.000000e+00 : f32
    %167 = vector.broadcast %cst_46 : f32 to vector<8x32xf32>
    %168 = arith.subf %167, %166 : vector<8x32xf32>
    %169 = math.exp %168 : vector<8x32xf32>
    %cst_47 = arith.constant 1.000000e+00 : f32
    %170 = vector.broadcast %cst_47 : f32 to vector<8x32xf32>
    %171 = arith.addf %170, %169 : vector<8x32xf32>
    %cst_48 = arith.constant 1.000000e+00 : f32
    %172 = vector.broadcast %cst_48 : f32 to vector<8x32xf32>
    %173 = arith.divf %172, %171 : vector<8x32xf32>
    %174 = vector.extract_strided_slice %150 {offsets = [0, 64], sizes = [8, 32], strides = [1, 1]} : vector<8x96xf32> to vector<8x32xf32>
    %175 = vector.extract_strided_slice %153 {offsets = [0, 64], sizes = [8, 32], strides = [1, 1]} : vector<8x96xf32> to vector<8x32xf32>
    %176 = arith.mulf %163, %175 : vector<8x32xf32>
    %177 = arith.addf %174, %176 : vector<8x32xf32>
    %178 = math.tanh %177 : vector<8x32xf32>
    %cst_49 = arith.constant 1.000000e+00 : f32
    %179 = vector.broadcast %cst_49 : f32 to vector<8x32xf32>
    %180 = arith.subf %179, %173 : vector<8x32xf32>
    %181 = arith.mulf %180, %178 : vector<8x32xf32>
    %182 = arith.mulf %173, %149 : vector<8x32xf32>
    %183 = arith.addf %181, %182 : vector<8x32xf32>
    %184 = vector.extract_strided_slice %10 {offsets = [40, 0], sizes = [8, 96], strides = [1, 1]} : vector<64x96xf32> to vector<8x96xf32>
    %cst_50 = arith.constant dense<0.000000e+00> : vector<8x96xf32>
    %185 = tpu.matmul %183, %11, %cst_50 {dimension_numbers = #tpu.dot_dimension_numbers<[1], [0], [0], [1], [0, 0, 1, 1], [], []>} : vector<8x32xf32>, vector<32x96xf32>, vector<8x96xf32> -> vector<8x96xf32>
    %186 = vector.broadcast %12 : vector<1x96xf32> to vector<8x96xf32>
    %187 = arith.addf %185, %186 : vector<8x96xf32>
    %188 = vector.extract_strided_slice %184 {offsets = [0, 0], sizes = [8, 32], strides = [1, 1]} : vector<8x96xf32> to vector<8x32xf32>
    %189 = vector.extract_strided_slice %187 {offsets = [0, 0], sizes = [8, 32], strides = [1, 1]} : vector<8x96xf32> to vector<8x32xf32>
    %190 = arith.addf %188, %189 : vector<8x32xf32>
    %cst_51 = arith.constant 0.000000e+00 : f32
    %191 = vector.broadcast %cst_51 : f32 to vector<8x32xf32>
    %192 = arith.subf %191, %190 : vector<8x32xf32>
    %193 = math.exp %192 : vector<8x32xf32>
    %cst_52 = arith.constant 1.000000e+00 : f32
    %194 = vector.broadcast %cst_52 : f32 to vector<8x32xf32>
    %195 = arith.addf %194, %193 : vector<8x32xf32>
    %cst_53 = arith.constant 1.000000e+00 : f32
    %196 = vector.broadcast %cst_53 : f32 to vector<8x32xf32>
    %197 = arith.divf %196, %195 : vector<8x32xf32>
    %198 = vector.extract_strided_slice %184 {offsets = [0, 32], sizes = [8, 32], strides = [1, 1]} : vector<8x96xf32> to vector<8x32xf32>
    %199 = vector.extract_strided_slice %187 {offsets = [0, 32], sizes = [8, 32], strides = [1, 1]} : vector<8x96xf32> to vector<8x32xf32>
    %200 = arith.addf %198, %199 : vector<8x32xf32>
    %cst_54 = arith.constant 0.000000e+00 : f32
    %201 = vector.broadcast %cst_54 : f32 to vector<8x32xf32>
    %202 = arith.subf %201, %200 : vector<8x32xf32>
    %203 = math.exp %202 : vector<8x32xf32>
    %cst_55 = arith.constant 1.000000e+00 : f32
    %204 = vector.broadcast %cst_55 : f32 to vector<8x32xf32>
    %205 = arith.addf %204, %203 : vector<8x32xf32>
    %cst_56 = arith.constant 1.000000e+00 : f32
    %206 = vector.broadcast %cst_56 : f32 to vector<8x32xf32>
    %207 = arith.divf %206, %205 : vector<8x32xf32>
    %208 = vector.extract_strided_slice %184 {offsets = [0, 64], sizes = [8, 32], strides = [1, 1]} : vector<8x96xf32> to vector<8x32xf32>
    %209 = vector.extract_strided_slice %187 {offsets = [0, 64], sizes = [8, 32], strides = [1, 1]} : vector<8x96xf32> to vector<8x32xf32>
    %210 = arith.mulf %197, %209 : vector<8x32xf32>
    %211 = arith.addf %208, %210 : vector<8x32xf32>
    %212 = math.tanh %211 : vector<8x32xf32>
    %cst_57 = arith.constant 1.000000e+00 : f32
    %213 = vector.broadcast %cst_57 : f32 to vector<8x32xf32>
    %214 = arith.subf %213, %207 : vector<8x32xf32>
    %215 = arith.mulf %214, %212 : vector<8x32xf32>
    %216 = arith.mulf %207, %183 : vector<8x32xf32>
    %217 = arith.addf %215, %216 : vector<8x32xf32>
    %218 = vector.extract_strided_slice %10 {offsets = [48, 0], sizes = [8, 96], strides = [1, 1]} : vector<64x96xf32> to vector<8x96xf32>
    %cst_58 = arith.constant dense<0.000000e+00> : vector<8x96xf32>
    %219 = tpu.matmul %217, %11, %cst_58 {dimension_numbers = #tpu.dot_dimension_numbers<[1], [0], [0], [1], [0, 0, 1, 1], [], []>} : vector<8x32xf32>, vector<32x96xf32>, vector<8x96xf32> -> vector<8x96xf32>
    %220 = vector.broadcast %12 : vector<1x96xf32> to vector<8x96xf32>
    %221 = arith.addf %219, %220 : vector<8x96xf32>
    %222 = vector.extract_strided_slice %218 {offsets = [0, 0], sizes = [8, 32], strides = [1, 1]} : vector<8x96xf32> to vector<8x32xf32>
    %223 = vector.extract_strided_slice %221 {offsets = [0, 0], sizes = [8, 32], strides = [1, 1]} : vector<8x96xf32> to vector<8x32xf32>
    %224 = arith.addf %222, %223 : vector<8x32xf32>
    %cst_59 = arith.constant 0.000000e+00 : f32
    %225 = vector.broadcast %cst_59 : f32 to vector<8x32xf32>
    %226 = arith.subf %225, %224 : vector<8x32xf32>
    %227 = math.exp %226 : vector<8x32xf32>
    %cst_60 = arith.constant 1.000000e+00 : f32
    %228 = vector.broadcast %cst_60 : f32 to vector<8x32xf32>
    %229 = arith.addf %228, %227 : vector<8x32xf32>
    %cst_61 = arith.constant 1.000000e+00 : f32
    %230 = vector.broadcast %cst_61 : f32 to vector<8x32xf32>
    %231 = arith.divf %230, %229 : vector<8x32xf32>
    %232 = vector.extract_strided_slice %218 {offsets = [0, 32], sizes = [8, 32], strides = [1, 1]} : vector<8x96xf32> to vector<8x32xf32>
    %233 = vector.extract_strided_slice %221 {offsets = [0, 32], sizes = [8, 32], strides = [1, 1]} : vector<8x96xf32> to vector<8x32xf32>
    %234 = arith.addf %232, %233 : vector<8x32xf32>
    %cst_62 = arith.constant 0.000000e+00 : f32
    %235 = vector.broadcast %cst_62 : f32 to vector<8x32xf32>
    %236 = arith.subf %235, %234 : vector<8x32xf32>
    %237 = math.exp %236 : vector<8x32xf32>
    %cst_63 = arith.constant 1.000000e+00 : f32
    %238 = vector.broadcast %cst_63 : f32 to vector<8x32xf32>
    %239 = arith.addf %238, %237 : vector<8x32xf32>
    %cst_64 = arith.constant 1.000000e+00 : f32
    %240 = vector.broadcast %cst_64 : f32 to vector<8x32xf32>
    %241 = arith.divf %240, %239 : vector<8x32xf32>
    %242 = vector.extract_strided_slice %218 {offsets = [0, 64], sizes = [8, 32], strides = [1, 1]} : vector<8x96xf32> to vector<8x32xf32>
    %243 = vector.extract_strided_slice %221 {offsets = [0, 64], sizes = [8, 32], strides = [1, 1]} : vector<8x96xf32> to vector<8x32xf32>
    %244 = arith.mulf %231, %243 : vector<8x32xf32>
    %245 = arith.addf %242, %244 : vector<8x32xf32>
    %246 = math.tanh %245 : vector<8x32xf32>
    %cst_65 = arith.constant 1.000000e+00 : f32
    %247 = vector.broadcast %cst_65 : f32 to vector<8x32xf32>
    %248 = arith.subf %247, %241 : vector<8x32xf32>
    %249 = arith.mulf %248, %246 : vector<8x32xf32>
    %250 = arith.mulf %241, %217 : vector<8x32xf32>
    %251 = arith.addf %249, %250 : vector<8x32xf32>
    %252 = vector.extract_strided_slice %10 {offsets = [56, 0], sizes = [8, 96], strides = [1, 1]} : vector<64x96xf32> to vector<8x96xf32>
    %cst_66 = arith.constant dense<0.000000e+00> : vector<8x96xf32>
    %253 = tpu.matmul %251, %11, %cst_66 {dimension_numbers = #tpu.dot_dimension_numbers<[1], [0], [0], [1], [0, 0, 1, 1], [], []>} : vector<8x32xf32>, vector<32x96xf32>, vector<8x96xf32> -> vector<8x96xf32>
    %254 = vector.broadcast %12 : vector<1x96xf32> to vector<8x96xf32>
    %255 = arith.addf %253, %254 : vector<8x96xf32>
    %256 = vector.extract_strided_slice %252 {offsets = [0, 0], sizes = [8, 32], strides = [1, 1]} : vector<8x96xf32> to vector<8x32xf32>
    %257 = vector.extract_strided_slice %255 {offsets = [0, 0], sizes = [8, 32], strides = [1, 1]} : vector<8x96xf32> to vector<8x32xf32>
    %258 = arith.addf %256, %257 : vector<8x32xf32>
    %cst_67 = arith.constant 0.000000e+00 : f32
    %259 = vector.broadcast %cst_67 : f32 to vector<8x32xf32>
    %260 = arith.subf %259, %258 : vector<8x32xf32>
    %261 = math.exp %260 : vector<8x32xf32>
    %cst_68 = arith.constant 1.000000e+00 : f32
    %262 = vector.broadcast %cst_68 : f32 to vector<8x32xf32>
    %263 = arith.addf %262, %261 : vector<8x32xf32>
    %cst_69 = arith.constant 1.000000e+00 : f32
    %264 = vector.broadcast %cst_69 : f32 to vector<8x32xf32>
    %265 = arith.divf %264, %263 : vector<8x32xf32>
    %266 = vector.extract_strided_slice %252 {offsets = [0, 32], sizes = [8, 32], strides = [1, 1]} : vector<8x96xf32> to vector<8x32xf32>
    %267 = vector.extract_strided_slice %255 {offsets = [0, 32], sizes = [8, 32], strides = [1, 1]} : vector<8x96xf32> to vector<8x32xf32>
    %268 = arith.addf %266, %267 : vector<8x32xf32>
    %cst_70 = arith.constant 0.000000e+00 : f32
    %269 = vector.broadcast %cst_70 : f32 to vector<8x32xf32>
    %270 = arith.subf %269, %268 : vector<8x32xf32>
    %271 = math.exp %270 : vector<8x32xf32>
    %cst_71 = arith.constant 1.000000e+00 : f32
    %272 = vector.broadcast %cst_71 : f32 to vector<8x32xf32>
    %273 = arith.addf %272, %271 : vector<8x32xf32>
    %cst_72 = arith.constant 1.000000e+00 : f32
    %274 = vector.broadcast %cst_72 : f32 to vector<8x32xf32>
    %275 = arith.divf %274, %273 : vector<8x32xf32>
    %276 = vector.extract_strided_slice %252 {offsets = [0, 64], sizes = [8, 32], strides = [1, 1]} : vector<8x96xf32> to vector<8x32xf32>
    %277 = vector.extract_strided_slice %255 {offsets = [0, 64], sizes = [8, 32], strides = [1, 1]} : vector<8x96xf32> to vector<8x32xf32>
    %278 = arith.mulf %265, %277 : vector<8x32xf32>
    %279 = arith.addf %276, %278 : vector<8x32xf32>
    %280 = math.tanh %279 : vector<8x32xf32>
    %cst_73 = arith.constant 1.000000e+00 : f32
    %281 = vector.broadcast %cst_73 : f32 to vector<8x32xf32>
    %282 = arith.subf %281, %275 : vector<8x32xf32>
    %283 = arith.mulf %282, %280 : vector<8x32xf32>
    %284 = arith.mulf %275, %251 : vector<8x32xf32>
    %285 = arith.addf %283, %284 : vector<8x32xf32>
    %286 = tpu.concatenate %47, %81, %115, %149, %183, %217, %251, %285 in 0 : vector<8x32xf32>, vector<8x32xf32>, vector<8x32xf32>, vector<8x32xf32>, vector<8x32xf32>, vector<8x32xf32>, vector<8x32xf32>, vector<8x32xf32> -> vector<64x32xf32>
    %c0_74 = arith.constant 0 : index
    %c0_75 = arith.constant 0 : index
    %287 = vector.load %arg7[%c0_74, %c0_75] : memref<32x32xf32, #tpu.memory_space<vmem>>, vector<32x32xf32>
    %cst_76 = arith.constant dense<0.000000e+00> : vector<64x32xf32>
    %288 = tpu.matmul %286, %287, %cst_76 {dimension_numbers = #tpu.dot_dimension_numbers<[1], [0], [0], [1], [0, 0, 1, 1], [], []>} : vector<64x32xf32>, vector<32x32xf32>, vector<64x32xf32> -> vector<64x32xf32>
    %c0_77 = arith.constant 0 : index
    %c0_78 = arith.constant 0 : index
    %289 = vector.load %arg8[%c0_77, %c0_78] : memref<1x32xf32, #tpu.memory_space<vmem>>, vector<1x32xf32>
    %290 = vector.broadcast %289 : vector<1x32xf32> to vector<64x32xf32>
    %291 = arith.addf %288, %290 : vector<64x32xf32>
    %292 = math.tanh %291 : vector<64x32xf32>
    %c0_79 = arith.constant 0 : index
    %c0_80 = arith.constant 0 : index
    %293 = vector.load %arg9[%c0_79, %c0_80] : memref<1x32xf32, #tpu.memory_space<vmem>>, vector<1x32xf32>
    %294 = vector.broadcast %293 : vector<1x32xf32> to vector<64x32xf32>
    %295 = arith.mulf %292, %294 : vector<64x32xf32>
    %cst_81 = arith.constant dense<0.000000e+00> : vector<64xf32>
    %296 = vector.multi_reduction <add>, %295, %cst_81 [1] : vector<64x32xf32> to vector<64xf32>
    %297 = vector.shape_cast %296 : vector<64xf32> to vector<64x1xf32>
    %c0_82 = arith.constant 0 : index
    %c0_83 = arith.constant 0 : index
    %298 = vector.load %arg10[%c0_82, %c0_83] : memref<1x1xf32, #tpu.memory_space<vmem>>, vector<1x1xf32>
    %299 = vector.broadcast %298 : vector<1x1xf32> to vector<64x1xf32>
    %300 = arith.addf %297, %299 : vector<64x1xf32>
    %c0_i32 = arith.constant 0 : i32
    %301 = vector.broadcast %c0_i32 : i32 to vector<64x1xi32>
    %302 = arith.cmpi ne, %0, %301 : vector<64x1xi32>
    %303 = arith.extui %302 : vector<64x1xi1> to vector<64x1xi32>
    %304 = arith.sitofp %303 : vector<64x1xi32> to vector<64x1xf32>
    %305 = tpu.iota {dimensions = array<i32: 1>} : vector<8x8xi32>
    %cst_84 = arith.constant 0.000000e+00 : f32
    %306 = vector.broadcast %cst_84 : f32 to vector<8x8xf32>
    %cst_85 = arith.constant 0.000000e+00 : f32
    %307 = vector.broadcast %cst_85 : f32 to vector<8x8xf32>
    %c0_i32_86 = arith.constant 0 : i32
    %308 = vector.broadcast %c0_i32_86 : i32 to vector<8x8xi32>
    %309 = arith.cmpi eq, %305, %308 : vector<8x8xi32>
    %310 = vector.extract_strided_slice %300 {offsets = [0, 0], sizes = [8, 1], strides = [1, 1]} : vector<64x1xf32> to vector<8x1xf32>
    %311 = vector.shape_cast %310 : vector<8x1xf32> to vector<8x1xf32>
    %312 = vector.broadcast %311 : vector<8x1xf32> to vector<8x8xf32>
    %313 = arith.select %309, %312, %306 : vector<8x8xi1>, vector<8x8xf32>
    %c0_i32_87 = arith.constant 0 : i32
    %314 = vector.broadcast %c0_i32_87 : i32 to vector<8x8xi32>
    %315 = arith.cmpi eq, %305, %314 : vector<8x8xi32>
    %316 = vector.extract_strided_slice %304 {offsets = [0, 0], sizes = [8, 1], strides = [1, 1]} : vector<64x1xf32> to vector<8x1xf32>
    %317 = vector.shape_cast %316 : vector<8x1xf32> to vector<8x1xf32>
    %318 = vector.broadcast %317 : vector<8x1xf32> to vector<8x8xf32>
    %319 = arith.select %315, %318, %307 : vector<8x8xi1>, vector<8x8xf32>
    %c1_i32 = arith.constant 1 : i32
    %320 = vector.broadcast %c1_i32 : i32 to vector<8x8xi32>
    %321 = arith.cmpi eq, %305, %320 : vector<8x8xi32>
    %322 = vector.extract_strided_slice %300 {offsets = [8, 0], sizes = [8, 1], strides = [1, 1]} : vector<64x1xf32> to vector<8x1xf32>
    %323 = vector.shape_cast %322 : vector<8x1xf32> to vector<8x1xf32>
    %324 = vector.broadcast %323 : vector<8x1xf32> to vector<8x8xf32>
    %325 = arith.select %321, %324, %313 : vector<8x8xi1>, vector<8x8xf32>
    %c1_i32_88 = arith.constant 1 : i32
    %326 = vector.broadcast %c1_i32_88 : i32 to vector<8x8xi32>
    %327 = arith.cmpi eq, %305, %326 : vector<8x8xi32>
    %328 = vector.extract_strided_slice %304 {offsets = [8, 0], sizes = [8, 1], strides = [1, 1]} : vector<64x1xf32> to vector<8x1xf32>
    %329 = vector.shape_cast %328 : vector<8x1xf32> to vector<8x1xf32>
    %330 = vector.broadcast %329 : vector<8x1xf32> to vector<8x8xf32>
    %331 = arith.select %327, %330, %319 : vector<8x8xi1>, vector<8x8xf32>
    %c2_i32 = arith.constant 2 : i32
    %332 = vector.broadcast %c2_i32 : i32 to vector<8x8xi32>
    %333 = arith.cmpi eq, %305, %332 : vector<8x8xi32>
    %334 = vector.extract_strided_slice %300 {offsets = [16, 0], sizes = [8, 1], strides = [1, 1]} : vector<64x1xf32> to vector<8x1xf32>
    %335 = vector.shape_cast %334 : vector<8x1xf32> to vector<8x1xf32>
    %336 = vector.broadcast %335 : vector<8x1xf32> to vector<8x8xf32>
    %337 = arith.select %333, %336, %325 : vector<8x8xi1>, vector<8x8xf32>
    %c2_i32_89 = arith.constant 2 : i32
    %338 = vector.broadcast %c2_i32_89 : i32 to vector<8x8xi32>
    %339 = arith.cmpi eq, %305, %338 : vector<8x8xi32>
    %340 = vector.extract_strided_slice %304 {offsets = [16, 0], sizes = [8, 1], strides = [1, 1]} : vector<64x1xf32> to vector<8x1xf32>
    %341 = vector.shape_cast %340 : vector<8x1xf32> to vector<8x1xf32>
    %342 = vector.broadcast %341 : vector<8x1xf32> to vector<8x8xf32>
    %343 = arith.select %339, %342, %331 : vector<8x8xi1>, vector<8x8xf32>
    %c3_i32 = arith.constant 3 : i32
    %344 = vector.broadcast %c3_i32 : i32 to vector<8x8xi32>
    %345 = arith.cmpi eq, %305, %344 : vector<8x8xi32>
    %346 = vector.extract_strided_slice %300 {offsets = [24, 0], sizes = [8, 1], strides = [1, 1]} : vector<64x1xf32> to vector<8x1xf32>
    %347 = vector.shape_cast %346 : vector<8x1xf32> to vector<8x1xf32>
    %348 = vector.broadcast %347 : vector<8x1xf32> to vector<8x8xf32>
    %349 = arith.select %345, %348, %337 : vector<8x8xi1>, vector<8x8xf32>
    %c3_i32_90 = arith.constant 3 : i32
    %350 = vector.broadcast %c3_i32_90 : i32 to vector<8x8xi32>
    %351 = arith.cmpi eq, %305, %350 : vector<8x8xi32>
    %352 = vector.extract_strided_slice %304 {offsets = [24, 0], sizes = [8, 1], strides = [1, 1]} : vector<64x1xf32> to vector<8x1xf32>
    %353 = vector.shape_cast %352 : vector<8x1xf32> to vector<8x1xf32>
    %354 = vector.broadcast %353 : vector<8x1xf32> to vector<8x8xf32>
    %355 = arith.select %351, %354, %343 : vector<8x8xi1>, vector<8x8xf32>
    %c4_i32 = arith.constant 4 : i32
    %356 = vector.broadcast %c4_i32 : i32 to vector<8x8xi32>
    %357 = arith.cmpi eq, %305, %356 : vector<8x8xi32>
    %358 = vector.extract_strided_slice %300 {offsets = [32, 0], sizes = [8, 1], strides = [1, 1]} : vector<64x1xf32> to vector<8x1xf32>
    %359 = vector.shape_cast %358 : vector<8x1xf32> to vector<8x1xf32>
    %360 = vector.broadcast %359 : vector<8x1xf32> to vector<8x8xf32>
    %361 = arith.select %357, %360, %349 : vector<8x8xi1>, vector<8x8xf32>
    %c4_i32_91 = arith.constant 4 : i32
    %362 = vector.broadcast %c4_i32_91 : i32 to vector<8x8xi32>
    %363 = arith.cmpi eq, %305, %362 : vector<8x8xi32>
    %364 = vector.extract_strided_slice %304 {offsets = [32, 0], sizes = [8, 1], strides = [1, 1]} : vector<64x1xf32> to vector<8x1xf32>
    %365 = vector.shape_cast %364 : vector<8x1xf32> to vector<8x1xf32>
    %366 = vector.broadcast %365 : vector<8x1xf32> to vector<8x8xf32>
    %367 = arith.select %363, %366, %355 : vector<8x8xi1>, vector<8x8xf32>
    %c5_i32 = arith.constant 5 : i32
    %368 = vector.broadcast %c5_i32 : i32 to vector<8x8xi32>
    %369 = arith.cmpi eq, %305, %368 : vector<8x8xi32>
    %370 = vector.extract_strided_slice %300 {offsets = [40, 0], sizes = [8, 1], strides = [1, 1]} : vector<64x1xf32> to vector<8x1xf32>
    %371 = vector.shape_cast %370 : vector<8x1xf32> to vector<8x1xf32>
    %372 = vector.broadcast %371 : vector<8x1xf32> to vector<8x8xf32>
    %373 = arith.select %369, %372, %361 : vector<8x8xi1>, vector<8x8xf32>
    %c5_i32_92 = arith.constant 5 : i32
    %374 = vector.broadcast %c5_i32_92 : i32 to vector<8x8xi32>
    %375 = arith.cmpi eq, %305, %374 : vector<8x8xi32>
    %376 = vector.extract_strided_slice %304 {offsets = [40, 0], sizes = [8, 1], strides = [1, 1]} : vector<64x1xf32> to vector<8x1xf32>
    %377 = vector.shape_cast %376 : vector<8x1xf32> to vector<8x1xf32>
    %378 = vector.broadcast %377 : vector<8x1xf32> to vector<8x8xf32>
    %379 = arith.select %375, %378, %367 : vector<8x8xi1>, vector<8x8xf32>
    %c6_i32 = arith.constant 6 : i32
    %380 = vector.broadcast %c6_i32 : i32 to vector<8x8xi32>
    %381 = arith.cmpi eq, %305, %380 : vector<8x8xi32>
    %382 = vector.extract_strided_slice %300 {offsets = [48, 0], sizes = [8, 1], strides = [1, 1]} : vector<64x1xf32> to vector<8x1xf32>
    %383 = vector.shape_cast %382 : vector<8x1xf32> to vector<8x1xf32>
    %384 = vector.broadcast %383 : vector<8x1xf32> to vector<8x8xf32>
    %385 = arith.select %381, %384, %373 : vector<8x8xi1>, vector<8x8xf32>
    %c6_i32_93 = arith.constant 6 : i32
    %386 = vector.broadcast %c6_i32_93 : i32 to vector<8x8xi32>
    %387 = arith.cmpi eq, %305, %386 : vector<8x8xi32>
    %388 = vector.extract_strided_slice %304 {offsets = [48, 0], sizes = [8, 1], strides = [1, 1]} : vector<64x1xf32> to vector<8x1xf32>
    %389 = vector.shape_cast %388 : vector<8x1xf32> to vector<8x1xf32>
    %390 = vector.broadcast %389 : vector<8x1xf32> to vector<8x8xf32>
    %391 = arith.select %387, %390, %379 : vector<8x8xi1>, vector<8x8xf32>
    %c7_i32 = arith.constant 7 : i32
    %392 = vector.broadcast %c7_i32 : i32 to vector<8x8xi32>
    %393 = arith.cmpi eq, %305, %392 : vector<8x8xi32>
    %394 = vector.extract_strided_slice %300 {offsets = [56, 0], sizes = [8, 1], strides = [1, 1]} : vector<64x1xf32> to vector<8x1xf32>
    %395 = vector.shape_cast %394 : vector<8x1xf32> to vector<8x1xf32>
    %396 = vector.broadcast %395 : vector<8x1xf32> to vector<8x8xf32>
    %397 = arith.select %393, %396, %385 : vector<8x8xi1>, vector<8x8xf32>
    %c7_i32_94 = arith.constant 7 : i32
    %398 = vector.broadcast %c7_i32_94 : i32 to vector<8x8xi32>
    %399 = arith.cmpi eq, %305, %398 : vector<8x8xi32>
    %400 = vector.extract_strided_slice %304 {offsets = [56, 0], sizes = [8, 1], strides = [1, 1]} : vector<64x1xf32> to vector<8x1xf32>
    %401 = vector.shape_cast %400 : vector<8x1xf32> to vector<8x1xf32>
    %402 = vector.broadcast %401 : vector<8x1xf32> to vector<8x8xf32>
    %403 = arith.select %399, %402, %391 : vector<8x8xi1>, vector<8x8xf32>
    %cst_95 = arith.constant dense<0xFF800000> : vector<8xf32>
    %404 = vector.multi_reduction <maximumf>, %397, %cst_95 [1] : vector<8x8xf32> to vector<8xf32>
    %405 = vector.shape_cast %404 : vector<8xf32> to vector<8x1xf32>
    %406 = vector.broadcast %405 : vector<8x1xf32> to vector<8x8xf32>
    %407 = arith.subf %397, %406 : vector<8x8xf32>
    %408 = math.exp %407 : vector<8x8xf32>
    %cst_96 = arith.constant dense<0.000000e+00> : vector<8xf32>
    %409 = vector.multi_reduction <add>, %408, %cst_96 [1] : vector<8x8xf32> to vector<8xf32>
    %410 = vector.shape_cast %409 : vector<8xf32> to vector<8x1xf32>
    %411 = vector.broadcast %410 : vector<8x1xf32> to vector<8x8xf32>
    %412 = arith.divf %408, %411 : vector<8x8xf32>
    %413 = arith.mulf %412, %403 : vector<8x8xf32>
    %cst_97 = arith.constant dense<0.000000e+00> : vector<8xf32>
    %414 = vector.multi_reduction <add>, %413, %cst_97 [1] : vector<8x8xf32> to vector<8xf32>
    %415 = vector.shape_cast %414 : vector<8xf32> to vector<8x1xf32>
    %cst_98 = arith.constant 1.000000e-10 : f32
    %416 = vector.broadcast %cst_98 : f32 to vector<8x1xf32>
    %417 = arith.addf %415, %416 : vector<8x1xf32>
    %418 = vector.broadcast %417 : vector<8x1xf32> to vector<8x8xf32>
    %419 = arith.divf %413, %418 : vector<8x8xf32>
    %cst_99 = arith.constant 0.000000e+00 : f32
    %420 = vector.broadcast %cst_99 : f32 to vector<8x32xf32>
    %421 = vector.extract_strided_slice %419 {offsets = [0, 0], sizes = [8, 1], strides = [1, 1]} : vector<8x8xf32> to vector<8x1xf32>
    %422 = vector.broadcast %421 : vector<8x1xf32> to vector<8x32xf32>
    %423 = arith.mulf %422, %47 : vector<8x32xf32>
    %424 = arith.addf %420, %423 : vector<8x32xf32>
    %425 = vector.extract_strided_slice %419 {offsets = [0, 1], sizes = [8, 1], strides = [1, 1]} : vector<8x8xf32> to vector<8x1xf32>
    %426 = vector.broadcast %425 : vector<8x1xf32> to vector<8x32xf32>
    %427 = arith.mulf %426, %81 : vector<8x32xf32>
    %428 = arith.addf %424, %427 : vector<8x32xf32>
    %429 = vector.extract_strided_slice %419 {offsets = [0, 2], sizes = [8, 1], strides = [1, 1]} : vector<8x8xf32> to vector<8x1xf32>
    %430 = vector.broadcast %429 : vector<8x1xf32> to vector<8x32xf32>
    %431 = arith.mulf %430, %115 : vector<8x32xf32>
    %432 = arith.addf %428, %431 : vector<8x32xf32>
    %433 = vector.extract_strided_slice %419 {offsets = [0, 3], sizes = [8, 1], strides = [1, 1]} : vector<8x8xf32> to vector<8x1xf32>
    %434 = vector.broadcast %433 : vector<8x1xf32> to vector<8x32xf32>
    %435 = arith.mulf %434, %149 : vector<8x32xf32>
    %436 = arith.addf %432, %435 : vector<8x32xf32>
    %437 = vector.extract_strided_slice %419 {offsets = [0, 4], sizes = [8, 1], strides = [1, 1]} : vector<8x8xf32> to vector<8x1xf32>
    %438 = vector.broadcast %437 : vector<8x1xf32> to vector<8x32xf32>
    %439 = arith.mulf %438, %183 : vector<8x32xf32>
    %440 = arith.addf %436, %439 : vector<8x32xf32>
    %441 = vector.extract_strided_slice %419 {offsets = [0, 5], sizes = [8, 1], strides = [1, 1]} : vector<8x8xf32> to vector<8x1xf32>
    %442 = vector.broadcast %441 : vector<8x1xf32> to vector<8x32xf32>
    %443 = arith.mulf %442, %217 : vector<8x32xf32>
    %444 = arith.addf %440, %443 : vector<8x32xf32>
    %445 = vector.extract_strided_slice %419 {offsets = [0, 6], sizes = [8, 1], strides = [1, 1]} : vector<8x8xf32> to vector<8x1xf32>
    %446 = vector.broadcast %445 : vector<8x1xf32> to vector<8x32xf32>
    %447 = arith.mulf %446, %251 : vector<8x32xf32>
    %448 = arith.addf %444, %447 : vector<8x32xf32>
    %449 = vector.extract_strided_slice %419 {offsets = [0, 7], sizes = [8, 1], strides = [1, 1]} : vector<8x8xf32> to vector<8x1xf32>
    %450 = vector.broadcast %449 : vector<8x1xf32> to vector<8x32xf32>
    %451 = arith.mulf %450, %285 : vector<8x32xf32>
    %452 = arith.addf %448, %451 : vector<8x32xf32>
    %c0_100 = arith.constant 0 : index
    %c0_101 = arith.constant 0 : index
    %453 = vector.load %arg1[%c0_100, %c0_101] : memref<8x12xf32, #tpu.memory_space<vmem>>, vector<8x12xf32>
    %c0_102 = arith.constant 0 : index
    %c0_103 = arith.constant 0 : index
    %454 = vector.load %arg11[%c0_102, %c0_103] : memref<12x32xf32, #tpu.memory_space<vmem>>, vector<12x32xf32>
    %cst_104 = arith.constant dense<0.000000e+00> : vector<8x32xf32>
    %455 = tpu.matmul %453, %454, %cst_104 {dimension_numbers = #tpu.dot_dimension_numbers<[1], [0], [0], [1], [0, 0, 1, 1], [], []>} : vector<8x12xf32>, vector<12x32xf32>, vector<8x32xf32> -> vector<8x32xf32>
    %c0_105 = arith.constant 0 : index
    %c0_106 = arith.constant 0 : index
    %456 = vector.load %arg2[%c0_105, %c0_106] : memref<8x6xf32, #tpu.memory_space<vmem>>, vector<8x6xf32>
    %c0_107 = arith.constant 0 : index
    %c0_108 = arith.constant 0 : index
    %457 = vector.load %arg12[%c0_107, %c0_108] : memref<6x32xf32, #tpu.memory_space<vmem>>, vector<6x32xf32>
    %cst_109 = arith.constant dense<0.000000e+00> : vector<8x32xf32>
    %458 = tpu.matmul %456, %457, %cst_109 {dimension_numbers = #tpu.dot_dimension_numbers<[1], [0], [0], [1], [0, 0, 1, 1], [], []>} : vector<8x6xf32>, vector<6x32xf32>, vector<8x32xf32> -> vector<8x32xf32>
    %459 = arith.addf %455, %458 : vector<8x32xf32>
    %c0_110 = arith.constant 0 : index
    %c0_111 = arith.constant 0 : index
    %460 = vector.load %arg13[%c0_110, %c0_111] : memref<32x32xf32, #tpu.memory_space<vmem>>, vector<32x32xf32>
    %cst_112 = arith.constant dense<0.000000e+00> : vector<8x32xf32>
    %461 = tpu.matmul %452, %460, %cst_112 {dimension_numbers = #tpu.dot_dimension_numbers<[1], [0], [0], [1], [0, 0, 1, 1], [], []>} : vector<8x32xf32>, vector<32x32xf32>, vector<8x32xf32> -> vector<8x32xf32>
    %462 = arith.addf %459, %461 : vector<8x32xf32>
    %c0_113 = arith.constant 0 : index
    %c0_114 = arith.constant 0 : index
    %463 = vector.load %arg14[%c0_113, %c0_114] : memref<1x32xf32, #tpu.memory_space<vmem>>, vector<1x32xf32>
    %464 = vector.broadcast %463 : vector<1x32xf32> to vector<8x32xf32>
    %465 = arith.addf %462, %464 : vector<8x32xf32>
    %466 = vector.extract_strided_slice %465 {offsets = [0, 0], sizes = [8, 16], strides = [1, 1]} : vector<8x32xf32> to vector<8x16xf32>
    %467 = vector.extract_strided_slice %465 {offsets = [0, 16], sizes = [8, 16], strides = [1, 1]} : vector<8x32xf32> to vector<8x16xf32>
    %c0_115 = arith.constant 0 : index
    %c0_116 = arith.constant 0 : index
    %468 = vector.load %arg16[%c0_115, %c0_116] : memref<8x16xf32, #tpu.memory_space<vmem>>, vector<8x16xf32>
    tpu.vector_store %arg16[%c0_115, %c0_116], %466 {strides = array<i32>} : memref<8x16xf32, #tpu.memory_space<vmem>>, vector<8x16xf32>,
    %c0_117 = arith.constant 0 : index
    %c0_118 = arith.constant 0 : index
    %469 = vector.load %arg17[%c0_117, %c0_118] : memref<8x16xf32, #tpu.memory_space<vmem>>, vector<8x16xf32>
    tpu.vector_store %arg17[%c0_117, %c0_118], %467 {strides = array<i32>} : memref<8x16xf32, #tpu.memory_space<vmem>>, vector<8x16xf32>,
    %470 = math.tanh %466 : vector<8x16xf32>
    %cst_119 = arith.constant 5.000000e+00 : f32
    %471 = vector.broadcast %cst_119 : f32 to vector<8x16xf32>
    %472 = arith.mulf %471, %470 : vector<8x16xf32>
    %c0_120 = arith.constant 0 : index
    %c0_121 = arith.constant 0 : index
    %473 = vector.load %arg15[%c0_120, %c0_121] : memref<8x16xf32, #tpu.memory_space<vmem>>, vector<8x16xf32>
    tpu.vector_store %arg15[%c0_120, %c0_121], %472 {strides = array<i32>} : memref<8x16xf32, #tpu.memory_space<vmem>>, vector<8x16xf32>,
    return
  }
}

</mosaic_0001>

<bundles_post_ra>
// kernel: deterministic_gaussian_actor_forward.1
= control target key start
LH: loop header
LB: loop body
LE: loop exit
PB: predicated region body
PF: predicated region fallthrough
CT: control target
= control target key end

     0   :  { %s3223_s0 = inlined_call_operand.vmem [shape: s32[64,1], index: 0, kind: input, shape index: {}]   ;;  %s3224_s1 = inlined_call_operand.vmem [shape: f32[8,12], index: 1, kind: input, shape index: {}]   ;;  %s3225_s2 = inlined_call_operand.vmem [shape: f32[8,6], index: 2, kind: input, shape index: {}]   ;;  %s3226_s3 = inlined_call_operand.vmem [shape: f32[50,96], index: 3, kind: input, shape index: {}]   ;;  %s3227_s4 = inlined_call_operand.vmem [shape: f32[1,96], index: 4, kind: input, shape index: {}]   ;;  %s3228_s5 = inlined_call_operand.vmem [shape: f32[32,96], index: 5, kind: input, shape index: {}]   ;;  %s3229_s6 = inlined_call_operand.hbm [shape: f32[1,96], index: 6, kind: input, shape index: {}]   ;;  %s3230_s7 = inlined_call_operand.vmem [shape: f32[32,32], index: 7, kind: input, shape index: {}]   ;;  %s3231_s8 = inlined_call_operand.hbm [shape: f32[1,32], index: 8, kind: input, shape index: {}]   ;;  %s3232_s9 = inlined_call_operand.hbm [shape: f32[1,32], index: 9, kind: input, shape index: {}]   ;;  %s3233_s10 = inlined_call_operand.<no memory space> [shape: f32[1,1], index: 10, kind: input, shape index: {}]   ;;  %s3234_s11 = inlined_call_operand.hbm [shape: f32[12,32], index: 11, kind: input, shape index: {}]   ;;  %s3235_s12 = inlined_call_operand.hbm [shape: f32[6,32], index: 12, kind: input, shape index: {}]   ;;  %s3236_s13 = inlined_call_operand.hbm [shape: f32[32,32], index: 13, kind: input, shape index: {}]   ;;  %s3237_s14 = inlined_call_operand.hbm [shape: f32[1,32], index: 14, kind: input, shape index: {}]   ;;  %s3238_s15 = inlined_call_operand.hbm [shape: f32[8,16], index: 15, kind: output, shape index: {0}]   ;;  %s3239_s16 = inlined_call_operand.hbm [shape: f32[8,16], index: 16, kind: output, shape index: {1}]   ;;  %s3240_s17 = inlined_call_operand.hbm [shape: f32[8,16], index: 17, kind: output, shape index: {2}]  }
   0x1   :  { %3242 = sst [smem:[#allocation25_spill]] %s3223_s0  ;;  %v23_v0 = vstv %s3233_s10 }
   0x2   :  { %3243 = sst [smem:[#allocation26_spill]] %s3224_s1  ;;  %24 = vst [vmem:[#allocation2] sm:$0x1] %v23_v0 }
   0x3   :  { %25 = vsyncpa [#allocation4], 0 }
   0x4   :  { %26 = vsyncpa [#allocation7], 0 }
   0x5   :  { %27 = vsyncpa [#allocation10], 0 }
   0x6   :  { %28 = vsyncpa [#allocation13], 0 }
   0x7   :  { %29 = vsyncpa [#allocation5], 0 }
   0x8   :  { %30 = vsyncpa [#allocation17], 0  ;;  %s2573_s26 = smov [#allocation6]   ;;  %s2574_s28 = smov [#allocation9]  }
   0x9   :  { %s61_s27 = sshll.u32 %s2573_s26, 4  ;;  %s82_s29 = sshll.u32 %s2574_s28, 4  ;;  %s62_s27 = int_to_ptr.vmem [resolvable:$true] %s61_s27  ;;  %s2693_s29 = int_to_ptr.vmem [resolvable:$true] %s82_s29 }
   0xa   :  { %s2341_s18 = scalar_lea.hbm %s3231_s8, 16 }
   0xb   :  { %p2342_p0 = scmp.ne.s32.totalorder %s3231_s8, %s2341_s18  ;;  %p2345_p1 = scmp.lt.u32.totalorder %s2341_s18, %s3231_s8 }
   0xd   :  { %p2347_p2 = pnand %p2345_p1, %p2342_p0 }
   0xf   :  { %2350 = shalt.err (!%p2347_p2)
}
  0x10   :  { %s2351_s21 = scalar_lea.vmem %s62_s27, 16  ;;  %s2355_s22 = scalar_lea.vmem %s62_s27, 32 }
  0x11   :  { %p2352_p3 = scmp.ne.s32.totalorder %s62_s27, %s2351_s21  ;;  %p2356_p4 = scmp.lt.s32.totalorder %s62_s27, %s62_s27 }
  0x12   :  { %p2357_p5 = scmp.lt.s32.totalorder %s2355_s22, %s2351_s21 }
  0x14   :  { %p2358_p6 = por %p2357_p5, %p2356_p4 }
  0x16   :  { %p2359_p7 = pnand %p2358_p6, %p2352_p3 }
  0x18   :  { %2362 = shalt.err (!%p2359_p7)
}
  0x19   :  { %64 = dma.hbm_to_vmem [thread:$0]  %s3231_s8, 16, %s62_s27, [#allocation7]  }
  0x1a   :  { %s2363_s28 = scalar_lea.hbm %s3234_s11, 256 }
  0x1b   :  { %p2364_p8 = scmp.ne.s32.totalorder %s3234_s11, %s2363_s28  ;;  %p2367_p9 = scmp.lt.u32.totalorder %s2363_s28, %s3234_s11 }
  0x1d   :  { %p2369_p10 = pnand %p2367_p9, %p2364_p8 }
  0x1f   :  { %2372 = shalt.err (!%p2369_p10)
}
  0x20   :  { %s2373_s10 = scalar_lea.vmem %s2693_s29, 256  ;;  %p2378_p12 = scmp.lt.s32.totalorder %s2693_s29, %s2693_s29 }
  0x21   :  { %p2374_p11 = scmp.ne.s32.totalorder %s2693_s29, %s2373_s10  ;;  %p2379_p13 = scmp.lt.s32.totalorder %s2373_s10, %s2373_s10 }
  0x23   :  { %p2380_p0 = por %p2379_p13, %p2378_p12 }
  0x25   :  { %p2381_p1 = pnand %p2380_p0, %p2374_p11 }
  0x27   :  { %2384 = shalt.err (!%p2381_p1)
}
  0x28   :  { %s2575_s8 = smov 128   ;;  %s2576_s27 = smov 8  }
  0x29   :  { %88 = dma.hbm_to_vmem [thread:$0]  %s3234_s11, 256, %s2693_s29, [#allocation10], %s2575_s8, %s2575_s8, %s2576_s27  }
  0x2a   :  { %s2577_s21 = smov [#allocation12]   ;;  %s2578_s23 = smov [#allocation3]  }
  0x2b   :  { %s104_s22 = sshll.u32 %s2577_s21, 4  ;;  %s49_s24 = sshll.u32 %s2578_s23, 4  ;;  %s105_s22 = int_to_ptr.vmem [resolvable:$true] %s104_s22  ;;  %s50_s24 = int_to_ptr.vmem [resolvable:$true] %s49_s24 }
  0x2c   :  { %s2385_s28 = scalar_lea.hbm %s3236_s13, 512 }
  0x2d   :  { %p2386_p2 = scmp.ne.s32.totalorder %s3236_s13, %s2385_s28  ;;  %p2389_p3 = scmp.lt.u32.totalorder %s2385_s28, %s3236_s13 }
  0x2f   :  { %p2391_p4 = pnand %p2389_p3, %p2386_p2 }
  0x31   :  { %2394 = shalt.err (!%p2391_p4)
}
  0x32   :  { %s2395_s11 = scalar_lea.vmem %s105_s22, 512  ;;  %p2400_p6 = scmp.lt.s32.totalorder %s105_s22, %s105_s22 }
  0x33   :  { %p2396_p5 = scmp.ne.s32.totalorder %s105_s22, %s2395_s11  ;;  %p2401_p7 = scmp.lt.s32.totalorder %s2395_s11, %s2395_s11 }
  0x35   :  { %p2402_p8 = por %p2401_p7, %p2400_p6 }
  0x37   :  { %p2403_p9 = pnand %p2402_p8, %p2396_p5 }
  0x39   :  { %2406 = shalt.err (!%p2403_p9)
}
  0x3a   :  { %110 = dma.hbm_to_vmem [thread:$0]  %s3236_s13, 512, %s105_s22, [#allocation13], %s2575_s8, %s2575_s8, %s2576_s27  }
  0x3b   :  { %s2407_s21 = scalar_lea.hbm %s3229_s6, 16 }
  0x3c   :  { %p2408_p10 = scmp.ne.s32.totalorder %s3229_s6, %s2407_s21  ;;  %p2411_p11 = scmp.lt.u32.totalorder %s2407_s21, %s3229_s6 }
  0x3e   :  { %p2413_p12 = pnand %p2411_p11, %p2408_p10 }
  0x40   :  { %2416 = shalt.err (!%p2413_p12)
}
  0x41   :  { %s2417_s0 = scalar_lea.vmem %s50_s24, 16  ;;  %s2421_s30 = scalar_lea.vmem %s50_s24, 32 }
  0x42   :  { %p2418_p13 = scmp.ne.s32.totalorder %s50_s24, %s2417_s0  ;;  %p2422_p0 = scmp.lt.s32.totalorder %s50_s24, %s50_s24 }
  0x43   :  { %p2423_p1 = scmp.lt.s32.totalorder %s2421_s30, %s2417_s0 }
  0x45   :  { %p2424_p2 = por %p2423_p1, %p2422_p0 }
  0x47   :  { %p2425_p3 = pnand %p2424_p2, %p2418_p13 }
  0x49   :  { %2428 = shalt.err (!%p2425_p3)
}
  0x4a   :  { %52 = dma.hbm_to_vmem [thread:$0]  %s3229_s6, 16, %s50_s24, [#allocation4]  }
  0x4b   :  { %s2579_s27 = smov [#allocation8]   ;;  %s2580_s18 = smov [#allocation11]  }
  0x4c   :  { %s71_s22 = sshll.u32 %s2579_s27, 4  ;;  %s95_s19 = sshll.u32 %s2580_s18, 4  ;;  %s72_s22 = int_to_ptr.vmem [resolvable:$true] %s71_s22  ;;  %s96_s19 = int_to_ptr.vmem [resolvable:$true] %s95_s19 }
  0x4d   :  { %s2429_s10 = scalar_lea.hbm %s3232_s9, 16 }
  0x4e   :  { %p2430_p4 = scmp.ne.s32.totalorder %s3232_s9, %s2429_s10  ;;  %p2433_p5 = scmp.lt.u32.totalorder %s2429_s10, %s3232_s9 }
  0x50   :  { %p2435_p6 = pnand %p2433_p5, %p2430_p4 }
  0x52   :  { %2438 = shalt.err (!%p2435_p6)
}
  0x53   :  { %s2439_s6 = scalar_lea.vmem %s72_s22, 16  ;;  %s2443_s24 = scalar_lea.vmem %s72_s22, 32 }
  0x54   :  { %p2440_p7 = scmp.ne.s32.totalorder %s72_s22, %s2439_s6  ;;  %p2444_p8 = scmp.lt.s32.totalorder %s72_s22, %s72_s22 }
  0x55   :  { %p2445_p9 = scmp.lt.s32.totalorder %s2443_s24, %s2439_s6 }
  0x57   :  { %p2446_p10 = por %p2445_p9, %p2444_p8 }
  0x59   :  { %p2447_p11 = pnand %p2446_p10, %p2440_p7 }
  0x5b   :  { %2450 = shalt.err (!%p2447_p11)
}
  0x5c   :  { %74 = dma.hbm_to_vmem [thread:$0]  %s3232_s9, 16, %s72_s22, [#allocation7]  }
  0x5d   :  { %s2451_s30 = scalar_lea.hbm %s3235_s12, 128 }
  0x5e   :  { %p2452_p12 = scmp.ne.s32.totalorder %s3235_s12, %s2451_s30  ;;  %p2455_p13 = scmp.lt.u32.totalorder %s2451_s30, %s3235_s12 }
  0x60   :  { %p2457_p0 = pnand %p2455_p13, %p2452_p12 }
  0x62   :  { %2460 = shalt.err (!%p2457_p0)
}
  0x63   :  { %s2461_s11 = scalar_lea.vmem %s96_s19, 128  ;;  %p2466_p2 = scmp.lt.s32.totalorder %s96_s19, %s96_s19 }
  0x64   :  { %p2462_p1 = scmp.ne.s32.totalorder %s96_s19, %s2461_s11  ;;  %p2467_p3 = scmp.lt.s32.totalorder %s2461_s11, %s2461_s11 }
  0x66   :  { %p2468_p4 = por %p2467_p3, %p2466_p2 }
  0x68   :  { %p2469_p5 = pnand %p2468_p4, %p2462_p1 }
  0x6a   :  { %2472 = shalt.err (!%p2469_p5)
}
  0x6b   :  { %98 = dma.hbm_to_vmem [thread:$0]  %s3235_s12, 128, %s96_s19, [#allocation10]  }
  0x6c   :  { %s2581_s29 = smov [#allocation14]   ;;  %s2473_s21 = scalar_lea.hbm %s3237_s14, 16 }
  0x6d   :  { %s117_s10 = sshll.u32 %s2581_s29, 4  ;;  %p2474_p6 = scmp.ne.s32.totalorder %s3237_s14, %s2473_s21  ;;  %s118_s10 = int_to_ptr.vmem [resolvable:$true] %s117_s10 }
  0x6e   :  { %p2477_p7 = scmp.lt.u32.totalorder %s2473_s21, %s3237_s14 }
  0x70   :  { %p2479_p8 = pnand %p2477_p7, %p2474_p6 }
  0x72   :  { %2482 = shalt.err (!%p2479_p8)
}
  0x73   :  { %s2483_s26 = scalar_lea.vmem %s118_s10, 16  ;;  %s2487_s12 = scalar_lea.vmem %s118_s10, 32 }
  0x74   :  { %p2484_p9 = scmp.ne.s32.totalorder %s118_s10, %s2483_s26  ;;  %p2488_p10 = scmp.lt.s32.totalorder %s118_s10, %s118_s10 }
  0x75   :  { %p2489_p11 = scmp.lt.s32.totalorder %s2487_s12, %s2483_s26 }
  0x77   :  { %p2490_p12 = por %p2489_p11, %p2488_p10 }
  0x79   :  { %p2491_p13 = pnand %p2490_p12, %p2484_p9 }
  0x7b   :  { %2494 = shalt.err (!%p2491_p13)
}
  0x7c   :  { %120 = dma.hbm_to_vmem [thread:$0]  %s3237_s14, 16, %s118_s10, [#allocation13]  }
  0x7d   :  { %2561 = dma.done.wait [#allocation4], 16  }
  0x7e   :  { %2562 = vsyncadd [#allocation4], 4294967280 }
  0x7f   :  { %2563 = dma.done.wait [#allocation7], 32  }
  0x80   :  { %2564 = vsyncadd [#allocation7], 4294967264 }
  0x81   :  { %2565 = dma.done.wait [#allocation10], 384  }
  0x82   :  { %2566 = vsyncadd [#allocation10], 4294966912 }
  0x83   :  { %2567 = dma.done.wait [#allocation13], 528  }
  0x84   :  { %2568 = vsyncadd [#allocation13], 4294966768  ;;  %v2582_v1 = vmov 0   ;;  %v2583_v2 = vmov 0.0|0.0   ;;  %vm2584_vm0 = vmmov 0   ;;  %v2585_v3 = vmov 0.0  }
  0x85   :  { %2239 = vset.pattern.permute.xlu0 %v2582_v1  ;;  %2146 = vmatprep.subr.bf16.mxu1 %v2583_v2  ;;  %s3244_s30 = sld [smem:[#allocation25_spill]]  ;;  %v348_v6 = vld [vmem:[%s3228_s5] sm:$0xff]  ;;  %v349_v7 = vld [vmem:[%s3228_s5 + $0x8] sm:$0xff]  ;;  %v350_v8 = vld [vmem:[%s3228_s5 + $0x10] sm:$0xff]  ;;  %vm239_vm1 = vcmask 1041408   ;;  %v150_v22 = vlaneseq  ;;  %vm214_vm2 = vcmask 408576  }
  0x86   :  { %2011 = vmatprep.mubr.msk.f32.mxu1 %vm2584_vm0, %v2585_v3  ;;  %2240 = vset.pattern.permute.xlu1 %v2582_v1  ;;  %v351_v9 = vld [vmem:[%s3228_s5 + $0x18] sm:$0xff]  ;;  %v2810_v10 = vpack.c.bf16 %v349_v7, %v348_v6  ;;  %v200_v11 = vld [vmem:[%s3226_s3] sm:$0xff]  ;;  %v201_v12 = vld [vmem:[%s3226_s3 + $0x8] sm:$0xff]  ;;  %vm359_vm5 = vcmask 261120   ;;  %s2596_s8 = smov [#allocation16]   ;;  %s2597_s18 = smov 112  }
  0x87   :  { %v202_v13 = vld [vmem:[%s3226_s3 + $0x10] sm:$0xff]  ;;  %v2134_v14 = vpack.c.bf16 %v201_v12, %v200_v11  ;;  %v203_v15 = vld [vmem:[%s3226_s3 + $0x18] sm:$0xff]  ;;  %v2825_v16 = vpack.c.bf16 %v351_v9, %v350_v8  ;;  %v204_v18 = vld [vmem:[%s3226_s3 + $0x20] sm:$0xff]  ;;  %v2848_v23 = vand.u32 127, %v150_v22  ;;  %s1820_s27 = sshll.u32 %s2596_s8, 4  ;;  %s1821_s27 = int_to_ptr.vmem [resolvable:$true] %s1820_s27 }
  0x88   :  { %2148 = vmatpush3.bf16.msra.mxu1 %v2810_v10  ;;  %v2138_v17 = vpack.c.bf16 %v203_v15, %v202_v13  ;;  %v205_v19 = vld [vmem:[%s3226_s3 + $0x28] sm:$0xff]  ;;  %v206_v21 = vld [vmem:[%s3226_s3 + $0x30] sm:$0x3]  ;;  %v2860_v28 = vld [vmem:[#allocation3] ss:$0 sm:$0xff]  ;;  %s2586_s3 = smov 64   ;;  %p2500_p1 = scmp.lt.s32.totalorder %s1821_s27, %s1821_s27 }
  0x89   :  { %2149 = vmatprep.subr.bf16.mxu1 %v2583_v2  ;;  %2135 = vmatprep.subr.bf16.mxu0 %v2134_v14  ;;  %v2142_v20 = vpack.c.bf16 %v205_v19, %v204_v18  ;;  %v2867_v32 = vld [vmem:[%s3227_s4] ss:$0 sm:$0xff]  ;;  %s2587_s4 = smov 96  }
  0x8a   :  { %2137 = vmatpush3.bf16.msra.mxu0 %v2134_v14 }
  0x8b   :  { %v2790_v4 = vld [vmem:[%s3244_s30] sm:$0xff]  ;;  %v2795_v5 = vld [vmem:[%s3244_s30 + $0x8] sm:$0xff]  ;;  %2139 = vmatprep.subr.bf16.mxu0 %v2138_v17  ;;  %v2894_v8 = vld [vmem:[%s3244_s30 + $0x10] sm:$0xff] }
  0x8c   :  { %153 = vperm.xlu0 %2239, %v2790_v4   ;;  %2151 = vmatpush3.bf16.msra.mxu1 %v2825_v16  ;;  %v2905_v15 = vld [vmem:[%s3244_s30 + $0x18] sm:$0xff]  ;;  %vm1351_vm12 = vcmp.ne.s32.totalorder %v2894_v8, 0  ;;  %vm1349_vm14 = vcmp.ne.s32.totalorder %v2790_v4, 0  ;;  %vm1350_vm15 = vcmp.ne.s32.totalorder %v2795_v5, 0 }
  0x8d   :  { %2152 = vmatprep.subr.bf16.mxu1 %v2583_v2  ;;  %vm1352_vm13 = vcmp.ne.s32.totalorder %v2905_v15, 0 }
  0x8e   :  { %2141 = vmatpush3.bf16.msra.mxu0 %v2138_v17 }
  0x8f   :  { %2012 = vmatmul.mubr.f32.vlgmr.msra.gmra.mrb[0].mxu1 %v2585_v3  ;;  %2143 = vmatprep.subr.bf16.mxu0 %v2142_v20 }
  0x90   :  { %156 = vperm.xlu0 %2239, %v2795_v5   ;;  %2154 = vmatpush3.bf16.msra.mxu1 %v2810_v10 }
  0x91   :  { %2155 = vmatprep.subr.bf16.mxu1 %v2583_v2  ;;  %2022 = vmatprep.mubr.msk.f32.mxu1 %vm2584_vm0, %v2585_v3 }
  0x92   :  { %2145 = vmatpush3.bf16.msra.mxu0 %v2142_v20 }
  0x93   :  { %1989 = vmatprep.subr.msk.mxu0 %vm239_vm1, %v206_v21 }
  0x94   :  { %2157 = vmatpush3.bf16.msra.mxu1 %v2825_v16 }
  0x95   :  { %2158 = vmatprep.subr.bf16.mxu1 %v2583_v2 }
  0x96   :  { %1990 = vmatpush3.msk.msra.mxu0 %vm239_vm1, %v206_v21  ;;  %vm1373_vm1 = vcmp.eq.s32.totalorder %v2848_v23, 0 }
  0x97   :  { %2164 = vmatprep.subr.bf16.mxu0 %v2583_v2 }
 0x10b   :  { %v154_v24 = vpop.permute.xlu0 %153 }
 0x10c   :  { %vm176_vm3 = vcmp.eq.s32.totalorder %v154_v24, %v2848_v23 }
 0x10d   :  { %v1849_v25 = vsel %vm176_vm3, 1.0, %v2585_v3  ;;  %vm1399_vm3 = vcmp.eq.s32.totalorder %v2848_v23, 2 }
 0x10e   :  { %1991 = vmatprep.mubr.msk.f32.mxu0 %vm214_vm2, %v1849_v25 }
 0x10f   :  { %v157_v26 = vpop.permute.xlu0 %156 }
 0x110   :  { %vm177_vm4 = vcmp.eq.s32.totalorder %v157_v26, %v2848_v23 }
 0x111   :  { %v1850_v27 = vsel %vm177_vm4, 1.0, %v2585_v3  ;;  %vm1412_vm4 = vcmp.eq.s32.totalorder %v2848_v23, 3 }
 0x112   :  { %1992 = vmatmul.mubr.msk.f32.vlgmr.msra.gmra.mrb[0].mxu0 %vm214_vm2, %v1850_v27 }
 0x113   :  { %2166 = vmatpush3.bf16.msra.mxu0 %v2810_v10 }
 0x114   :  { %2167 = vmatprep.subr.bf16.mxu0 %v2583_v2 }
 0x117   :  { %2169 = vmatpush3.bf16.msra.mxu0 %v2825_v16 }
 0x118   :  { %2176 = vmatprep.subr.bf16.mxu0 %v2583_v2 }
 0x162   :  { %v429_v29 = vpop.f32.mrb[0].mxu1 }
 0x163   :  { %v430_v30 = vadd.f32 %v2860_v28, %v429_v29  ;;  %v2013_v31 = vpop.f32.mrb[1].mxu1 }
 0x165   :  { %441 = vrot.lane.b32.xlu1 %v430_v30, %s2586_s3 }
 0x1d7   :  { %v442_v41 = vpop.permute.xlu1 %441 }
 0x1e5   :  { %v1993_v33 = vpop.f32.mrb[0].mxu0 }
 0x1e6   :  { %v309_v34 = vpop.f32.mrb[1].mxu0  ;;  %v315_v56 = vadd.f32 %v1993_v33, %v2867_v32 }
 0x1e7   :  { %v310_v35 = vadd.f32 %v2867_v32, %v309_v34 }
 0x1e9   :  { %v433_v36 = vadd.f32 %v430_v30, %v310_v35 }
 0x1eb   :  { %v434_v37 = vsub.f32 0.0, %v433_v36 }
 0x1ed   :  { %v435_v38 = vmul.f32 1.442695, %v434_v37 }
 0x1ef   :  { %2269 = vpow2.f32 %v435_v38 }
 0x1f9   :  { %v2270_v39 = vpop.eup %2269 }
 0x1fa   :  { %v437_v40 = vadd.f32 1.0, %v2270_v39  ;;  %v2933_v39 = vld [vmem:[%s3244_s30 + $0x20] sm:$0xff] }
 0x1fc   :  { %2271 = vrcp.f32 %v437_v40  ;;  %v2939_v40 = vld [vmem:[%s3244_s30 + $0x30] sm:$0xff] }
 0x206   :  { %v2272_v42 = vpop.eup %2271 }
 0x207   :  { %v444_v43 = vmul.f32 %v2272_v42, %v442_v41  ;;  %v451_v47 = vsub.f32 1.0, %v2272_v42  ;;  %v457_v49 = vmul.f32 0.0, %v2272_v42 }
 0x209   :  { %446 = vrot.lane.b32.xlu1 %v444_v43, %s2586_s3 }
 0x27b   :  { %v447_v44 = vpop.permute.xlu1 %446 }
 0x27c   :  { %v449_v45 = vadd.f32 %v447_v44, %v310_v35  ;;  %v2946_v44 = vld [vmem:[%s3244_s30 + $0x28] sm:$0xff] }
 0x27e   :  { %2273 = vtanh.f32 %v449_v45 }
 0x288   :  { %v2274_v46 = vpop.eup %2273 }
 0x289   :  { %453 = vrot.lane.b32.xlu0 %v2274_v46, %s2587_s4 }
 0x2fb   :  { %v454_v48 = vpop.permute.xlu0 %453 }
 0x2fc   :  { %v456_v50 = vmul.f32 %v454_v48, %v451_v47  ;;  %v2954_v47 = vld [vmem:[%s3244_s30 + $0x38] sm:$0xff] }
 0x2fe   :  { %v2872_v51 = vadd.f32 %v457_v49, %v456_v50 }
 0x300   :  { %460 = vrot.lane.b32.xlu1 %v2872_v51, %s2587_s4 }
 0x372   :  { %v2876_v52 = vpop.permute.xlu1 %460 }
 0x373   :  { %2023 = vmatmul.mubr.msk.f32.vlgmr.msra.gmra.mrb[2].mxu1 %vm359_vm5, %v2876_v52 }
 0x374   :  { %2160 = vmatpush3.bf16.msra.mxu1 %v2810_v10  ;;  %2033 = vmatprep.mubr.msk.f32.mxu1 %vm2584_vm0, %v2585_v3 }
 0x375   :  { %2161 = vmatprep.subr.bf16.mxu1 %v2583_v2 }
 0x378   :  { %2163 = vmatpush3.bf16.msra.mxu1 %v2825_v16 }
 0x379   :  { %2170 = vmatprep.subr.bf16.mxu1 %v2583_v2 }
 0x446   :  { %v530_v53 = vpop.f32.mrb[2].mxu1 }
 0x447   :  { %v531_v54 = vadd.f32 %v2860_v28, %v530_v53  ;;  %v2024_v55 = vpop.f32.mrb[3].mxu1 }
 0x449   :  { %542 = vrot.lane.b32.xlu0 %v531_v54, %s2586_s3  ;;  %v534_v57 = vadd.f32 %v531_v54, %v315_v56 }
 0x44b   :  { %v535_v58 = vsub.f32 0.0, %v534_v57 }
 0x44d   :  { %v536_v59 = vmul.f32 1.442695, %v535_v58 }
 0x44f   :  { %2275 = vpow2.f32 %v536_v59 }
 0x459   :  { %v2276_v60 = vpop.eup %2275 }
 0x45a   :  { %v538_v61 = vadd.f32 1.0, %v2276_v60 }
 0x45c   :  { %2277 = vrcp.f32 %v538_v61 }
 0x466   :  { %v2278_v62 = vpop.eup %2277 }
 0x467   :  { %v552_v9 = vsub.f32 1.0, %v2278_v62  ;;  %v558_v12 = vmul.f32 %v2278_v62, %v2872_v51 }
 0x4bb   :  { %v543_v63 = vpop.permute.xlu0 %542 }
 0x4bc   :  { %v545_v0 = vmul.f32 %v2278_v62, %v543_v63 }
 0x4be   :  { %547 = vrot.lane.b32.xlu1 %v545_v0, %s2586_s3 }
 0x530   :  { %v548_v1 = vpop.permute.xlu1 %547 }
 0x531   :  { %v550_v6 = vadd.f32 %v548_v1, %v315_v56 }
 0x533   :  { %2279 = vtanh.f32 %v550_v6 }
 0x53d   :  { %v2280_v7 = vpop.eup %2279 }
 0x53e   :  { %554 = vrot.lane.b32.xlu0 %v2280_v7, %s2587_s4 }
 0x542   :  { %159 = vperm.xlu0 %2239, %v2894_v8   ;;  %v1887_v8 = vsel %vm1350_vm15, 1.0, %v2585_v3  ;;  %vm1554_vm15 = vcmask 1045504  }
 0x5b0   :  { %v555_v11 = vpop.permute.xlu0 %554 }
 0x5b1   :  { %v557_v13 = vmul.f32 %v555_v11, %v552_v9 }
 0x5b3   :  { %v2898_v14 = vadd.f32 %v558_v12, %v557_v13 }
 0x5b5   :  { %561 = vrot.lane.b32.xlu1 %v2898_v14, %s2587_s4 }
 0x5b9   :  { %162 = vperm.xlu1 %2240, %v2905_v15  }
 0x5c1   :  { %v160_v17 = vpop.permute.xlu0 %159 }
 0x5c2   :  { %vm178_vm6 = vcmp.eq.s32.totalorder %v160_v17, %v2848_v23 }
 0x5c3   :  { %v1851_v18 = vsel %vm178_vm6, 1.0, %v2585_v3  ;;  %vm1425_vm6 = vcmp.eq.s32.totalorder %v2848_v23, 4 }
 0x5c4   :  { %1994 = vmatprep.mubr.msk.f32.mxu0 %vm214_vm2, %v1851_v18 }
 0x627   :  { %v2911_v19 = vpop.permute.xlu1 %561 }
 0x628   :  { %2034 = vmatmul.mubr.msk.f32.vlgmr.msra.gmra.mrb[4].mxu1 %vm359_vm5, %v2911_v19 }
 0x629   :  { %2172 = vmatpush3.bf16.msra.mxu1 %v2810_v10  ;;  %2055 = vmatprep.mubr.msk.f32.mxu1 %vm2584_vm0, %v2585_v3 }
 0x62a   :  { %2173 = vmatprep.subr.bf16.mxu1 %v2583_v2 }
 0x62d   :  { %2175 = vmatpush3.bf16.msra.mxu1 %v2825_v16 }
 0x62e   :  { %2182 = vmatprep.subr.bf16.mxu1 %v2583_v2 }
 0x638   :  { %v163_v20 = vpop.permute.xlu1 %162 }
 0x639   :  { %vm179_vm7 = vcmp.eq.s32.totalorder %v163_v20, %v2848_v23 }
 0x63a   :  { %v1852_v21 = vsel %vm179_vm7, 1.0, %v2585_v3  ;;  %vm1438_vm7 = vcmp.eq.s32.totalorder %v2848_v23, 5 }
 0x63b   :  { %1995 = vmatmul.mubr.msk.f32.gmra.mrb[2].mxu0 %vm214_vm2, %v1852_v21 }
 0x6fb   :  { %v631_v22 = vpop.f32.mrb[4].mxu1 }
 0x6fc   :  { %v632_v24 = vadd.f32 %v2860_v28, %v631_v22  ;;  %v2035_v25 = vpop.f32.mrb[5].mxu1 }
 0x6fe   :  { %643 = vrot.lane.b32.xlu0 %v632_v24, %s2586_s3 }
 0x70e   :  { %v2926_v26 = vpop.f32.mrb[2].mxu0 }
 0x70f   :  { %v319_v27 = vpop.f32.mrb[3].mxu0  ;;  %v325_v11 = vadd.f32 %v2926_v26, %v2867_v32 }
 0x710   :  { %v320_v29 = vadd.f32 %v2867_v32, %v319_v27 }
 0x712   :  { %v635_v30 = vadd.f32 %v632_v24, %v320_v29 }
 0x714   :  { %v636_v31 = vsub.f32 0.0, %v635_v30 }
 0x716   :  { %v637_v33 = vmul.f32 1.442695, %v636_v31 }
 0x718   :  { %2281 = vpow2.f32 %v637_v33 }
 0x722   :  { %v2282_v34 = vpop.eup %2281 }
 0x723   :  { %v639_v35 = vadd.f32 1.0, %v2282_v34 }
 0x725   :  { %2283 = vrcp.f32 %v639_v35 }
 0x72f   :  { %v2284_v36 = vpop.eup %2283 }
 0x730   :  { %v653_v48 = vsub.f32 1.0, %v2284_v36  ;;  %v659_v50 = vmul.f32 %v2284_v36, %v2898_v14 }
 0x770   :  { %v644_v37 = vpop.permute.xlu0 %643 }
 0x771   :  { %v646_v38 = vmul.f32 %v2284_v36, %v644_v37 }
 0x773   :  { %648 = vrot.lane.b32.xlu1 %v646_v38, %s2586_s3 }
 0x777   :  { %165 = vperm.xlu1 %2240, %v2933_v39  }
 0x77b   :  { %171 = vperm.xlu1 %2240, %v2939_v40  }
 0x7e5   :  { %v649_v41 = vpop.permute.xlu1 %648 }
 0x7e6   :  { %v651_v42 = vadd.f32 %v649_v41, %v320_v29 }
 0x7e8   :  { %2285 = vtanh.f32 %v651_v42 }
 0x7f2   :  { %v2286_v43 = vpop.eup %2285 }
 0x7f3   :  { %655 = vrot.lane.b32.xlu0 %v2286_v43, %s2587_s4 }
 0x7f6   :  { %v166_v45 = vpop.permute.xlu1 %165 }
 0x7f7   :  { %vm180_vm8 = vcmp.eq.s32.totalorder %v166_v45, %v2848_v23  ;;  %168 = vperm.xlu0 %2239, %v2946_v44  }
 0x7f8   :  { %v1853_v46 = vsel %vm180_vm8, 1.0, %v2585_v3  ;;  %vm1451_vm8 = vcmp.eq.s32.totalorder %v2848_v23, 6 }
 0x7f9   :  { %1997 = vmatprep.mubr.msk.f32.mxu0 %vm214_vm2, %v1853_v46 }
 0x7fa   :  { %v172_v55 = vpop.permute.xlu1 %171 }
 0x7fb   :  { %174 = vperm.xlu0 %2239, %v2954_v47   ;;  %vm182_vm9 = vcmp.eq.s32.totalorder %v172_v55, %v2848_v23 }
 0x7fc   :  { %v1855_v58 = vsel %vm182_vm9, 1.0, %v2585_v3  ;;  %vm1464_vm9 = vcmp.eq.s32.totalorder %v2848_v23, 7 }
 0x865   :  { %v656_v49 = vpop.permute.xlu0 %655 }
 0x866   :  { %v658_v53 = vmul.f32 %v656_v49, %v653_v48 }
 0x868   :  { %v2959_v54 = vadd.f32 %v659_v50, %v658_v53 }
 0x86a   :  { %662 = vrot.lane.b32.xlu1 %v2959_v54, %s2587_s4 }
 0x876   :  { %v169_v56 = vpop.permute.xlu0 %168 }
 0x877   :  { %vm181_vm10 = vcmp.eq.s32.totalorder %v169_v56, %v2848_v23 }
 0x878   :  { %v1854_v57 = vsel %vm181_vm10, 1.0, %v2585_v3  ;;  %vm1477_vm10 = vcmask 64512  }
 0x879   :  { %1998 = vmatmul.mubr.msk.f32.gmra.mrb[4].mxu0 %vm214_vm2, %v1854_v57 }
 0x87a   :  { %v175_v59 = vpop.permute.xlu0 %174  ;;  %2000 = vmatprep.mubr.msk.f32.mxu0 %vm214_vm2, %v1855_v58 }
 0x87b   :  { %vm183_vm11 = vcmp.eq.s32.totalorder %v175_v59, %v2848_v23 }
 0x87c   :  { %v1856_v60 = vsel %vm183_vm11, 1.0, %v2585_v3  ;;  %vm1353_vm11 = vcmp.ne.s32.totalorder %v2933_v39, 0 }
 0x87d   :  { %2001 = vmatmul.mubr.msk.f32.gmra.mrb[6].mxu0 %vm214_vm2, %v1856_v60  ;;  %vm1386_vm2 = vcmp.eq.s32.totalorder %v2848_v23, 1  ;;  %v2591_v23 = vmov 3  }
 0x87e   :  { %2044 = vmatprep.mubr.msk.f32.mxu0 %vm2584_vm0, %v2585_v3 }
 0x8dc   :  { %v2974_v61 = vpop.permute.xlu1 %662 }
 0x8dd   :  { %2045 = vmatmul.mubr.msk.f32.vlgmr.msra.gmra.mrb[8].mxu0 %vm359_vm5, %v2974_v61 }
 0x8de   :  { %2178 = vmatpush3.bf16.msra.mxu0 %v2810_v10  ;;  %2066 = vmatprep.mubr.msk.f32.mxu0 %vm2584_vm0, %v2585_v3 }
 0x8df   :  { %2179 = vmatprep.subr.bf16.mxu0 %v2583_v2 }
 0x8e2   :  { %2181 = vmatpush3.bf16.msra.mxu0 %v2825_v16 }
 0x8e3   :  { %2188 = vmatprep.subr.bf16.mxu0 %v2583_v2 }
 0x94c   :  { %v2984_v62 = vpop.f32.mrb[4].mxu0 }
 0x94d   :  { %v329_v63 = vpop.f32.mrb[5].mxu0 }
 0x94e   :  { %v330_v41 = vadd.f32 %v2867_v32, %v329_v63 }
 0x950   :  { %v2986_v0 = vpop.f32.mrb[6].mxu0 }
 0x951   :  { %v2988_v1 = vpop.f32.mrb[7].mxu0 }
 0x9b0   :  { %v732_v6 = vpop.f32.mrb[8].mxu0 }
 0x9b1   :  { %v733_v7 = vadd.f32 %v2860_v28, %v732_v6  ;;  %v2046_v9 = vpop.f32.mrb[9].mxu0 }
 0x9b3   :  { %744 = vrot.lane.b32.xlu0 %v733_v7, %s2586_s3  ;;  %v736_v12 = vadd.f32 %v733_v7, %v325_v11 }
 0x9b5   :  { %v737_v13 = vsub.f32 0.0, %v736_v12 }
 0x9b7   :  { %v738_v17 = vmul.f32 1.442695, %v737_v13  ;;  %v335_v13 = vadd.f32 %v2984_v62, %v2867_v32  ;;  %v1167_v62 = vld [vmem:[%s3230_s7 + $0x8] sm:$0xff] }
 0x9b9   :  { %2287 = vpow2.f32 %v738_v17 }
 0x9c3   :  { %v2288_v18 = vpop.eup %2287 }
 0x9c4   :  { %v740_v20 = vadd.f32 1.0, %v2288_v18 }
 0x9c6   :  { %2289 = vrcp.f32 %v740_v20 }
 0x9d0   :  { %v2290_v21 = vpop.eup %2289 }
 0x9d1   :  { %v754_v30 = vsub.f32 1.0, %v2290_v21  ;;  %v760_v31 = vmul.f32 %v2290_v21, %v2959_v54 }
 0xa25   :  { %v745_v22 = vpop.permute.xlu0 %744 }
 0xa26   :  { %v747_v24 = vmul.f32 %v2290_v21, %v745_v22 }
 0xa28   :  { %749 = vrot.lane.b32.xlu1 %v747_v24, %s2586_s3 }
 0xa9a   :  { %v750_v25 = vpop.permute.xlu1 %749 }
 0xa9b   :  { %v752_v27 = vadd.f32 %v750_v25, %v325_v11 }
 0xa9d   :  { %2291 = vtanh.f32 %v752_v27 }
 0xaa7   :  { %v2292_v29 = vpop.eup %2291 }
 0xaa8   :  { %756 = vrot.lane.b32.xlu0 %v2292_v29, %s2587_s4  ;;  %v1166_v29 = vld [vmem:[%s3230_s7] sm:$0xff] }
 0xb1a   :  { %v757_v26 = vpop.permute.xlu0 %756 }
 0xb1b   :  { %v759_v33 = vmul.f32 %v757_v26, %v754_v30  ;;  %v2194_v30 = vpack.c.bf16 %v1167_v62, %v1166_v29 }
 0xb1d   :  { %v2997_v34 = vadd.f32 %v760_v31, %v759_v33 }
 0xb1f   :  { %763 = vrot.lane.b32.xlu1 %v2997_v34, %s2587_s4 }
 0xb91   :  { %v3001_v35 = vpop.permute.xlu1 %763 }
 0xb92   :  { %2056 = vmatmul.mubr.msk.f32.vlgmr.msra.gmra.mrb[6].mxu1 %vm359_vm5, %v3001_v35 }
 0xb93   :  { %2184 = vmatpush3.bf16.msra.mxu1 %v2810_v10  ;;  %2077 = vmatprep.mubr.msk.f32.mxu1 %vm2584_vm0, %v2585_v3 }
 0xb94   :  { %2185 = vmatprep.subr.bf16.mxu1 %v2583_v2 }
 0xb97   :  { %2187 = vmatpush3.bf16.msra.mxu1 %v2825_v16 }
 0xb98   :  { %2195 = vmatprep.subr.bf16.mxu1 %v2194_v30 }
 0xc65   :  { %v833_v36 = vpop.f32.mrb[6].mxu1 }
 0xc66   :  { %v834_v37 = vadd.f32 %v2860_v28, %v833_v36  ;;  %v2057_v38 = vpop.f32.mrb[7].mxu1 }
 0xc68   :  { %845 = vrot.lane.b32.xlu0 %v834_v37, %s2586_s3  ;;  %v837_v42 = vadd.f32 %v834_v37, %v330_v41 }
 0xc6a   :  { %v838_v43 = vsub.f32 0.0, %v837_v42  ;;  %v1169_v42 = vld [vmem:[%s3230_s7 + $0x18] sm:$0xff] }
 0xc6c   :  { %v839_v45 = vmul.f32 1.442695, %v838_v43 }
 0xc6e   :  { %2293 = vpow2.f32 %v839_v45 }
 0xc78   :  { %v2294_v46 = vpop.eup %2293 }
 0xc79   :  { %v841_v48 = vadd.f32 1.0, %v2294_v46 }
 0xc7b   :  { %2295 = vrcp.f32 %v841_v48 }
 0xc85   :  { %v2296_v49 = vpop.eup %2295 }
 0xc86   :  { %v855_v58 = vsub.f32 1.0, %v2296_v49  ;;  %v861_v60 = vmul.f32 %v2296_v49, %v2997_v34 }
 0xcda   :  { %v846_v50 = vpop.permute.xlu0 %845 }
 0xcdb   :  { %v848_v53 = vmul.f32 %v2296_v49, %v846_v50 }
 0xcdd   :  { %850 = vrot.lane.b32.xlu1 %v848_v53, %s2586_s3 }
 0xd4f   :  { %v851_v55 = vpop.permute.xlu1 %850 }
 0xd50   :  { %v853_v56 = vadd.f32 %v851_v55, %v330_v41  ;;  %v1168_v41 = vld [vmem:[%s3230_s7 + $0x10] sm:$0xff] }
 0xd51   :  { %v2198_v43 = vpack.c.bf16 %v1169_v42, %v1168_v41  ;;  %v1875_v42 = vld [vmem:[#allocation6] ss:$0 sm:$0xff] }
 0xd52   :  { %2297 = vtanh.f32 %v853_v56 }
 0xd5c   :  { %v2298_v57 = vpop.eup %2297 }
 0xd5d   :  { %857 = vrot.lane.b32.xlu0 %v2298_v57, %s2587_s4 }
 0xdcf   :  { %v858_v59 = vpop.permute.xlu0 %857 }
 0xdd0   :  { %v860_v63 = vmul.f32 %v858_v59, %v855_v58 }
 0xdd2   :  { %v3016_v6 = vadd.f32 %v861_v60, %v860_v63 }
 0xdd4   :  { %864 = vrot.lane.b32.xlu1 %v3016_v6, %s2587_s4 }
 0xe46   :  { %v865_v7 = vpop.permute.xlu1 %864 }
 0xe47   :  { %2067 = vmatmul.mubr.msk.f32.vlgmr.msra.gmra.mrb[10].mxu0 %vm359_vm5, %v865_v7 }
 0xe48   :  { %2190 = vmatpush3.bf16.msra.mxu0 %v2810_v10  ;;  %2088 = vmatprep.mubr.msk.f32.mxu0 %vm2584_vm0, %v2585_v3 }
 0xe49   :  { %2191 = vmatprep.subr.bf16.mxu0 %v2583_v2 }
 0xe4c   :  { %2193 = vmatpush3.bf16.msra.mxu0 %v2825_v16 }
 0xe4d   :  { %2111 = vmatprep.subr.mxu0 %v2585_v3 }
 0xf1a   :  { %v934_v9 = vpop.f32.mrb[10].mxu0 }
 0xf1b   :  { %v935_v11 = vadd.f32 %v2860_v28, %v934_v9  ;;  %v2068_v12 = vpop.f32.mrb[11].mxu0 }
 0xf1d   :  { %946 = vrot.lane.b32.xlu0 %v935_v11, %s2586_s3  ;;  %v938_v17 = vadd.f32 %v935_v11, %v335_v13 }
 0xf1f   :  { %v939_v10 = vsub.f32 0.0, %v938_v17 }
 0xf21   :  { %v940_v18 = vmul.f32 1.442695, %v939_v10 }
 0xf23   :  { %2299 = vpow2.f32 %v940_v18 }
 0xf2d   :  { %v2300_v20 = vpop.eup %2299 }
 0xf2e   :  { %v942_v21 = vadd.f32 1.0, %v2300_v20 }
 0xf30   :  { %2301 = vrcp.f32 %v942_v21 }
 0xf3a   :  { %v2302_v22 = vpop.eup %2301 }
 0xf3b   :  { %v956_v31 = vsub.f32 1.0, %v2302_v22  ;;  %v962_v36 = vmul.f32 %v2302_v22, %v3016_v6 }
 0xf8f   :  { %v947_v16 = vpop.permute.xlu0 %946 }
 0xf90   :  { %v949_v24 = vmul.f32 %v2302_v22, %v947_v16 }
 0xf92   :  { %951 = vrot.lane.b32.xlu1 %v949_v24, %s2586_s3 }
0x1004   :  { %v952_v25 = vpop.permute.xlu1 %951 }
0x1005   :  { %v954_v27 = vadd.f32 %v952_v25, %v335_v13  ;;  %v345_v25 = vadd.f32 %v2986_v0, %v2867_v32 }
0x1007   :  { %2303 = vtanh.f32 %v954_v27 }
0x1011   :  { %v2304_v26 = vpop.eup %2303 }
0x1012   :  { %958 = vrot.lane.b32.xlu0 %v2304_v26, %s2587_s4 }
0x1084   :  { %v959_v33 = vpop.permute.xlu0 %958 }
0x1085   :  { %v961_v37 = vmul.f32 %v959_v33, %v956_v31 }
0x1087   :  { %v3040_v38 = vadd.f32 %v962_v36, %v961_v37 }
0x1089   :  { %965 = vrot.lane.b32.xlu1 %v3040_v38, %s2587_s4 }
0x10fb   :  { %v966_v45 = vpop.permute.xlu1 %965 }
0x10fc   :  { %2078 = vmatmul.mubr.msk.f32.vlgmr.msra.gmra.mrb[8].mxu1 %vm359_vm5, %v966_v45 }
0x10fd   :  { %2197 = vmatpush3.bf16.msra.mxu1 %v2194_v30  ;;  %2099 = vmatprep.mubr.msk.f32.mxu1 %vm359_vm5, %v2876_v52 }
0x10fe   :  { %2199 = vmatprep.subr.bf16.mxu1 %v2198_v43 }
0x1101   :  { %2201 = vmatpush3.bf16.msra.mxu1 %v2198_v43 }
0x1104   :  { %2100 = vmatmul.mubr.msk.f32.vlgmr.msra.gmra.mrb[10].mxu1 %vm359_vm5, %v2911_v19 }
0x1105   :  { %2102 = vmatprep.mubr.msk.f32.mxu1 %vm359_vm5, %v2974_v61 }
0x1108   :  { %2103 = vmatmul.mubr.msk.f32.gmra.mrb[12].mxu1 %vm359_vm5, %v3001_v35  ;;  %v340_v35 = vadd.f32 %v2867_v32, %v2988_v1 }
0x1109   :  { %2105 = vmatprep.mubr.msk.f32.mxu1 %vm359_vm5, %v865_v7 }
0x110c   :  { %2106 = vmatmul.mubr.msk.f32.gmra.mrb[14].mxu1 %vm359_vm5, %v966_v45 }
0x11cf   :  { %v1035_v46 = vpop.f32.mrb[8].mxu1 }
0x11d0   :  { %v1036_v48 = vadd.f32 %v2860_v28, %v1035_v46  ;;  %v2079_v49 = vpop.f32.mrb[9].mxu1 }
0x11d2   :  { %1047 = vrot.lane.b32.xlu0 %v1036_v48, %s2586_s3  ;;  %v1039_v56 = vadd.f32 %v1036_v48, %v340_v35  ;;  %v1884_v48 = vld [vmem:[#allocation8] ss:$0 sm:$0xff] }
0x11d4   :  { %v1040_v57 = vsub.f32 0.0, %v1039_v56 }
0x11d6   :  { %v1041_v58 = vmul.f32 1.442695, %v1040_v57 }
0x11d7   :  { %v3063_v52 = vpop.f32.mrb[10].mxu1 }
0x11d8   :  { %v1248_v50 = vpop.f32.mrb[11].mxu1  ;;  %2305 = vpow2.f32 %v1041_v58 }
0x11d9   :  { %v1249_v32 = vadd.f32 %v1875_v42, %v1248_v50 }
0x11db   :  { %v2104_v19 = vpop.f32.mrb[12].mxu1 }
0x11dc   :  { %v1258_v53 = vpop.f32.mrb[13].mxu1  ;;  %v1264_v43 = vadd.f32 %v2104_v19, %v1875_v42 }
0x11dd   :  { %v1259_v0 = vadd.f32 %v1875_v42, %v1258_v53 }
0x11df   :  { %v2107_v55 = vpop.f32.mrb[14].mxu1 }
0x11e0   :  { %v3065_v61 = vpop.f32.mrb[15].mxu1  ;;  %v1274_v45 = vadd.f32 %v2107_v55, %v1875_v42 }
0x11e2   :  { %v2306_v59 = vpop.eup %2305 }
0x11e3   :  { %v1043_v60 = vadd.f32 1.0, %v2306_v59 }
0x11e5   :  { %2307 = vrcp.f32 %v1043_v60 }
0x11ef   :  { %v2308_v63 = vpop.eup %2307 }
0x11f0   :  { %v1057_v17 = vsub.f32 1.0, %v2308_v63  ;;  %v1063_v10 = vmul.f32 %v2308_v63, %v3040_v38 }
0x1244   :  { %v1048_v7 = vpop.permute.xlu0 %1047 }
0x1245   :  { %v1050_v9 = vmul.f32 %v2308_v63, %v1048_v7 }
0x1247   :  { %1052 = vrot.lane.b32.xlu1 %v1050_v9, %s2586_s3 }
0x12b9   :  { %v1053_v11 = vpop.permute.xlu1 %1052 }
0x12ba   :  { %v1055_v12 = vadd.f32 %v1053_v11, %v340_v35 }
0x12bc   :  { %2309 = vtanh.f32 %v1055_v12 }
0x12c6   :  { %v2310_v13 = vpop.eup %2309 }
0x12c7   :  { %1059 = vrot.lane.b32.xlu0 %v2310_v13, %s2587_s4  ;;  %v1254_v13 = vadd.f32 %v3063_v52, %v1875_v42 }
0x1339   :  { %v1060_v1 = vpop.permute.xlu0 %1059 }
0x133a   :  { %v1062_v18 = vmul.f32 %v1060_v1, %v1057_v17  ;;  %v1269_v17 = vadd.f32 %v1875_v42, %v3065_v61 }
0x133c   :  { %v3072_v20 = vadd.f32 %v1063_v10, %v1062_v18 }
0x133e   :  { %1066 = vrot.lane.b32.xlu1 %v3072_v20, %s2587_s4 }
0x13b0   :  { %v1067_v21 = vpop.permute.xlu1 %1066 }
0x13b1   :  { %2089 = vmatmul.mubr.msk.f32.vlgmr.msra.gmra.mrb[12].mxu0 %vm359_vm5, %v1067_v21  ;;  %2108 = vmatprep.mubr.msk.f32.mxu1 %vm359_vm5, %v1067_v21 }
0x13b2   :  { %2113 = vmatprep.mubr.msk.f32.mxu0 %vm2584_vm0, %v2585_v3 }
0x1484   :  { %v1136_v22 = vpop.f32.mrb[12].mxu0 }
0x1485   :  { %v1137_v16 = vadd.f32 %v2860_v28, %v1136_v22  ;;  %v2090_v24 = vpop.f32.mrb[13].mxu0 }
0x1487   :  { %1148 = vrot.lane.b32.xlu0 %v1137_v16, %s2586_s3  ;;  %v1140_v27 = vadd.f32 %v1137_v16, %v345_v25 }
0x1489   :  { %v1141_v29 = vsub.f32 0.0, %v1140_v27 }
0x148b   :  { %v1142_v62 = vmul.f32 1.442695, %v1141_v29 }
0x148d   :  { %2311 = vpow2.f32 %v1142_v62 }
0x1497   :  { %v2312_v30 = vpop.eup %2311 }
0x1498   :  { %v1144_v26 = vadd.f32 1.0, %v2312_v30 }
0x149a   :  { %2313 = vrcp.f32 %v1144_v26 }
0x14a4   :  { %v2314_v31 = vpop.eup %2313 }
0x14a5   :  { %v1158_v63 = vsub.f32 1.0, %v2314_v31  ;;  %v1164_v9 = vmul.f32 %v2314_v31, %v3072_v20 }
0x14f9   :  { %v1149_v33 = vpop.permute.xlu0 %1148 }
0x14fa   :  { %v1151_v36 = vmul.f32 %v2314_v31, %v1149_v33 }
0x14fc   :  { %1153 = vrot.lane.b32.xlu1 %v1151_v36, %s2586_s3 }
0x156e   :  { %v1154_v37 = vpop.permute.xlu1 %1153 }
0x156f   :  { %v1156_v28 = vadd.f32 %v1154_v37, %v345_v25  ;;  %v1885_v37 = vld [vmem:[#allocation2] ss:$0 sm:$0xff] }
0x1571   :  { %2315 = vtanh.f32 %v1156_v28 }
0x1572   :  { %2317 = vtanh.f32 %v1249_v32 }
0x1573   :  { %2319 = vtanh.f32 %v1259_v0 }
0x1574   :  { %2321 = vtanh.f32 %v1264_v43 }
0x1575   :  { %2323 = vtanh.f32 %v1274_v45 }
0x1576   :  { %2325 = vtanh.f32 %v1254_v13 }
0x1577   :  { %2327 = vtanh.f32 %v1269_v17 }
0x157b   :  { %v2316_v41 = vpop.eup %2315 }
0x157c   :  { %1160 = vrot.lane.b32.xlu0 %v2316_v41, %s2587_s4  ;;  %v2318_v46 = vpop.eup %2317 }
0x157d   :  { %v1302_v49 = vmul.f32 %v2318_v46, %v1884_v48  ;;  %v2320_v35 = vpop.eup %2319 }
0x157e   :  { %v1304_v57 = vmul.f32 %v2320_v35, %v1884_v48  ;;  %v2322_v58 = vpop.eup %2321 }
0x157f   :  { %v1310_v56 = vsel %vm359_vm5, %v1302_v49, 0.0  ;;  %v1305_v60 = vmul.f32 %v2322_v58, %v1884_v48  ;;  %v2324_v50 = vpop.eup %2323 }
0x1580   :  { %v1316_v59 = vsel %vm359_vm5, %v1304_v57, 0.0  ;;  %v1307_v53 = vmul.f32 %v2324_v50, %v1884_v48  ;;  %v2326_v1 = vpop.eup %2325  ;;  %v1889_v57 = vsel %vm1352_vm13, 1.0, %v2585_v3  ;;  %vm1355_vm13 = vcmp.ne.s32.totalorder %v2939_v40, 0 }
0x1581   :  { %v1319_v19 = vsel %vm359_vm5, %v1305_v60, 0.0  ;;  %v1303_v10 = vmul.f32 %v2326_v1, %v1884_v48  ;;  %v2328_v18 = vpop.eup %2327  ;;  %v1892_v39 = vsel %vm1355_vm13, 1.0, %v2585_v3 }
0x1582   :  { %v1325_v55 = vsel %vm359_vm5, %v1307_v53, 0.0  ;;  %v1306_v22 = vmul.f32 %v2328_v18, %v1884_v48  ;;  %v1886_v53 = vsel %vm1349_vm14, 1.0, %v2585_v3  ;;  %vm1356_vm14 = vcmp.ne.s32.totalorder %v2954_v47, 0 }
0x1583   :  { %v1313_v21 = vsel %vm359_vm5, %v1303_v10, 0.0  ;;  %v2241_v15 = vpack.i.bf16 %v1887_v8, %v1886_v53 }
0x1584   :  { %v1322_v16 = vsel %vm359_vm5, %v1306_v22, 0.0 }
0x159b   :  { %1311 = vadd.xlane.f32.xlu0 %v1310_v56  ;;  %v1888_v56 = vsel %vm1351_vm12, 1.0, %v2585_v3  ;;  %vm1354_vm12 = vcmp.ne.s32.totalorder %v2946_v44, 0  ;;  %v1893_v44 = vsel %vm1356_vm14, 1.0, %v2585_v3 }
0x159f   :  { %1317 = vadd.xlane.f32.xlu0 %v1316_v59 }
0x15a3   :  { %1320 = vadd.xlane.f32.xlu0 %v1319_v19  ;;  %v2246_v19 = vpack.i.bf16 %v1889_v57, %v1888_v56 }
0x15a7   :  { %1326 = vadd.xlane.f32.xlu0 %v1325_v55 }
0x15ee   :  { %v1161_v7 = vpop.permute.xlu0 %1160 }
0x15ef   :  { %v1163_v11 = vmul.f32 %v1161_v7, %v1158_v63 }
0x15f1   :  { %v3091_v12 = vadd.f32 %v1164_v9, %v1163_v11 }
0x15f3   :  { %1178 = vrot.lane.b32.xlu1 %v3091_v12, %s2587_s4 }
0x1617   :  { %1314 = vadd.xlane.f32.xlu1 %v1313_v21 }
0x161b   :  { %1323 = vadd.xlane.f32.xlu1 %v1322_v16 }
0x1628   :  { %v1312_v36 = vpop.xlane.xlu0 %1311 }
0x1629   :  { %v1341_v32 = vadd.f32 %v1885_v37, %v1312_v36 }
0x162c   :  { %v1318_v28 = vpop.xlane.xlu0 %1317 }
0x1630   :  { %v1321_v0 = vpop.xlane.xlu0 %1320 }
0x1631   :  { %v1344_v46 = vadd.f32 %v1885_v37, %v1321_v0 }
0x1634   :  { %v1327_v49 = vpop.xlane.xlu0 %1326 }
0x1635   :  { %v1346_v35 = vadd.f32 %v1885_v37, %v1327_v49 }
0x1665   :  { %v1179_v24 = vpop.permute.xlu1 %1178 }
0x1666   :  { %2109 = vmatmul.mubr.msk.f32.gmra.mrb[16].mxu1 %vm359_vm5, %v1179_v24 }
0x16a4   :  { %v1315_v41 = vpop.xlane.xlu1 %1314 }
0x16a5   :  { %v1342_v43 = vadd.f32 %v1885_v37, %v1315_v41 }
0x16a8   :  { %v1324_v45 = vpop.xlane.xlu1 %1323 }
0x1739   :  { %v2110_v25 = vpop.f32.mrb[16].mxu1 }
0x173a   :  { %v1284_v27 = vadd.f32 %v2110_v25, %v1875_v42  ;;  %v1278_v52 = vpop.f32.mrb[17].mxu1 }
0x173b   :  { %v1279_v29 = vadd.f32 %v1875_v42, %v1278_v52  ;;  %v1343_v42 = vadd.f32 %v1885_v37, %v1318_v28  ;;  %v1891_v52 = vsel %vm1354_vm12, 1.0, %v2585_v3 }
0x173c   :  { %2329 = vtanh.f32 %v1284_v27  ;;  %v1890_v27 = vsel %vm1353_vm11, 1.0, %v2585_v3 }
0x173d   :  { %2331 = vtanh.f32 %v1279_v29  ;;  %v2251_v29 = vpack.i.bf16 %v1891_v52, %v1890_v27 }
0x1746   :  { %v2330_v61 = vpop.eup %2329 }
0x1747   :  { %v2332_v62 = vpop.eup %2331  ;;  %v1309_v30 = vmul.f32 %v2330_v61, %v1884_v48 }
0x1748   :  { %v1308_v26 = vmul.f32 %v2332_v62, %v1884_v48  ;;  %v1345_v48 = vadd.f32 %v1885_v37, %v1324_v45 }
0x1749   :  { %v1331_v31 = vsel %vm359_vm5, %v1309_v30, 0.0 }
0x174a   :  { %1332 = vadd.xlane.f32.xlu0 %v1331_v31  ;;  %v1328_v33 = vsel %vm359_vm5, %v1308_v26, 0.0 }
0x174b   :  { %1329 = vadd.xlane.f32.xlu1 %v1328_v33  ;;  %v2256_v33 = vpack.i.bf16 %v1893_v44, %v1892_v39 }
0x175c   :  { %1376 = vperm.xlu1 %2240, %v1341_v32  }
0x1760   :  { %1389 = vperm.xlu0 %2239, %v1342_v43   ;;  %1402 = vperm.xlu1 %2240, %v1343_v42  }
0x1764   :  { %1428 = vperm.xlu0 %2239, %v1345_v48   ;;  %1415 = vperm.xlu1 %2240, %v1344_v46  }
0x1768   :  { %1441 = vperm.xlu1 %2240, %v1346_v35  }
0x17d7   :  { %v1333_v58 = vpop.xlane.xlu0 %1332 }
0x17d8   :  { %v1348_v59 = vadd.f32 %v1885_v37, %v1333_v58  ;;  %v1330_v60 = vpop.xlane.xlu1 %1329 }
0x17d9   :  { %v1347_v50 = vadd.f32 %v1885_v37, %v1330_v60 }
0x17da   :  { %1467 = vperm.xlu1 %2240, %v1348_v59  }
0x17db   :  { %1454 = vperm.xlu0 %2239, %v1347_v50  }
0x17dc   :  { %v1377_v55 = vpop.permute.xlu1 %1376 }
0x17dd   :  { %v1379_v5 = vsel %vm1373_vm1, %v1377_v55, 0.0  ;;  %v2588_v55 = vmov 7  }
0x17de   :  { %2247 = vperm.xlu1 %2240, %v2246_v19  }
0x17df   :  { %v1390_v4 = vpop.permute.xlu0 %1389 }
0x17e0   :  { %v1403_v63 = vpop.permute.xlu1 %1402  ;;  %v1392_v9 = vsel %vm1386_vm2, %v1390_v4, %v1379_v5 }
0x17e1   :  { %v1405_v11 = vsel %vm1399_vm3, %v1403_v63, %v1392_v9  ;;  %v2589_v9 = vmov 1  }
0x17e3   :  { %v1429_v13 = vpop.permute.xlu0 %1428 }
0x17e4   :  { %v1416_v7 = vpop.permute.xlu1 %1415 }
0x17e5   :  { %v1418_v17 = vsel %vm1412_vm4, %v1416_v7, %v1405_v11  ;;  %v2590_v11 = vmov 2  }
0x17e6   :  { %v1431_v10 = vsel %vm1425_vm6, %v1429_v13, %v1418_v17  ;;  %v2592_v13 = vmov 4   ;;  %v2593_v17 = vmov 5  }
0x17e8   :  { %v1442_v1 = vpop.permute.xlu1 %1441 }
0x17e9   :  { %v1444_v18 = vsel %vm1438_vm7, %v1442_v1, %v1431_v10  ;;  %v2594_v1 = vmov 6   ;;  %v1549_v10 = vld [vmem:[#allocation11] sm:$0x3f] }
0x17ea   :  { %2112 = vmatpush3.msk.msra.mxu0 %vm1554_vm15, %v1549_v10 }
0x17eb   :  { %2202 = vmatprep.subr.bf16.mxu0 %v2583_v2 }
0x1859   :  { %v1468_v22 = vpop.permute.xlu1 %1467 }
0x185a   :  { %v1455_v21 = vpop.permute.xlu0 %1454 }
0x185b   :  { %v1457_v16 = vsel %vm1451_vm8, %v1455_v21, %v1444_v18  ;;  %v1548_v18 = vld [vmem:[%s3225_s2] sm:$0xff]  ;;  %s3245_s2 = sld [smem:[#allocation26_spill]] }
0x185c   :  { %v1470_v24 = vsel %vm1464_vm9, %v1468_v22, %v1457_v16  ;;  %v1546_v21 = vld [vmem:[#allocation9] sm:$0xff]  ;;  %v1547_v22 = vld [vmem:[#allocation9 + $0x8] sm:$0xf] }
0x185d   :  { %v1478_v25 = vsel %vm1477_vm10, %v1470_v24, -inf  ;;  %v2248_v32 = vpop.permute.xlu1 %2247  ;;  %v2203_v16 = vpack.c.bf16 %v1547_v22, %v1546_v21 }
0x185e   :  { %1479 = vmax.xlane.f32.xlu0 %v1478_v25  ;;  %v2249_v42 = vunpack.i.l.bf16 %v2248_v32  ;;  %v2250_v45 = vunpack.i.h.bf16 %v2248_v32  ;;  %v1707_v25 = vld [vmem:[#allocation12 + $0x8] sm:$0xff] }
0x1861   :  { %v1545_v27 = vld [vmem:[%s3245_s2] sm:$0xff] }
0x1874   :  { %2242 = vperm.xlu0 %2239, %v2241_v15  }
0x1878   :  { %2252 = vperm.xlu0 %2239, %v2251_v29   ;;  %v1708_v29 = vld [vmem:[#allocation12 + $0x10] sm:$0xff] }
0x187c   :  { %2268 = vset.pattern.permute.xlu0 %v2588_v55 }
0x18eb   :  { %v1480_v61 = vpop.xlane.xlu0 %1479 }
0x18ec   :  { %v1481_v62 = vsub.f32 %v1470_v24, %v1480_v61  ;;  %v1706_v24 = vld [vmem:[#allocation12] sm:$0xff]  ;;  %v1709_v61 = vld [vmem:[#allocation12 + $0x18] sm:$0xff] }
0x18ed   :  { %v2207_v52 = vpack.c.bf16 %v1707_v25, %v1706_v24 }
0x18ee   :  { %v1482_v30 = vmul.f32 1.442695, %v1481_v62  ;;  %v2210_v62 = vpack.c.bf16 %v1709_v61, %v1708_v29 }
0x18f0   :  { %2333 = vpow2.f32 %v1482_v30 }
0x18f3   :  { %v2243_v36 = vpop.permute.xlu0 %2242 }
0x18f4   :  { %v2244_v37 = vunpack.i.l.bf16 %v2243_v36  ;;  %v2245_v28 = vunpack.i.h.bf16 %v2243_v36 }
0x18f6   :  { %v1385_v41 = vsel %vm1373_vm1, %v2244_v37, 0.0  ;;  %vm1550_vm1 = vcmask 48128  }
0x18f7   :  { %v1398_v0 = vsel %vm1386_vm2, %v2245_v28, %v1385_v41  ;;  %v2253_v40 = vpop.permute.xlu0 %2252  ;;  %vm1632_vm2 = vcmask 1043456   ;;  %2114 = vmatmul.mubr.msk.f32.vlgmr.msra.gmra.mrb[14].mxu0 %vm1550_vm1, %v1548_v18 }
0x18f8   :  { %v1411_v47 = vsel %vm1399_vm3, %v2249_v42, %v1398_v0  ;;  %v2254_v46 = vunpack.i.l.bf16 %v2253_v40  ;;  %v2255_v35 = vunpack.i.h.bf16 %v2253_v40  ;;  %vm2595_vm3 = vmmov 1   ;;  %2120 = vmatprep.mubr.msk.f32.mxu0 %vm2584_vm0, %v2585_v3 }
0x18f9   :  { %v1424_v48 = vsel %vm1412_vm4, %v2250_v45, %v1411_v47  ;;  %vm2204_vm4 = vmpackc.low %vm1632_vm2, %vm2595_vm3 }
0x18fa   :  { %v2334_v26 = vpop.eup %2333  ;;  %v1437_v56 = vsel %vm1425_vm6, %v2254_v46, %v1424_v48  ;;  %2205 = vmatpush3.bf16.msk.msra.mxu0 %vm2204_vm4, %v2203_v16  ;;  %vm1628_vm6 = vcmask 97280  }
0x18fb   :  { %v1484_v31 = vsel %vm1477_vm10, %v2334_v26, 0.0  ;;  %v1450_v58 = vsel %vm1438_vm7, %v2255_v35, %v1437_v56  ;;  %2206 = vmatprep.subr.bf16.mxu0 %v2583_v2 }
0x18fc   :  { %1485 = vadd.xlane.f32.xlu1 %v1484_v31 }
0x18fd   :  { %2121 = vmatmul.mubr.msk.f32.vlgmr.msra.gmra.mrb[16].mxu0 %vm1628_vm6, %v1545_v27 }
0x18fe   :  { %2208 = vmatpush3.bf16.msra.mxu0 %v2207_v52  ;;  %2131 = vmatprep.mubr.msk.f32.mxu0 %vm2584_vm0, %v2585_v3  ;;  %vm1794_vm0 = vcmask 130048  }
0x18ff   :  { %2209 = vmatprep.subr.bf16.mxu0 %v2583_v2 }
0x1902   :  { %2211 = vmatpush3.bf16.msra.mxu0 %v2210_v62 }
0x190d   :  { %2257 = vperm.xlu1 %2240, %v2256_v33  }
0x1989   :  { %v1486_v43 = vpop.xlane.xlu1 %1485 }
0x198a   :  { %2335 = vrcp.f32 %v1486_v43 }
0x198d   :  { %v2258_v49 = vpop.permute.xlu1 %2257 }
0x198e   :  { %v2259_v57 = vunpack.i.l.bf16 %v2258_v49  ;;  %v2260_v59 = vunpack.i.h.bf16 %v2258_v49 }
0x1990   :  { %v1463_v60 = vsel %vm1451_vm8, %v2259_v57, %v1450_v58  ;;  %v1899_v57 = vld [vmem:[#allocation14] ss:$0 sm:$0xff] }
0x1991   :  { %v1476_v53 = vsel %vm1464_vm9, %v2260_v59, %v1463_v60 }
0x1994   :  { %v2336_v50 = vpop.eup %2335 }
0x1995   :  { %v1488_v19 = vmul.f32 %v2336_v50, %v2334_v26 }
0x1997   :  { %v1489_v8 = vmul.f32 %v1488_v19, %v1476_v53 }
0x1999   :  { %v1490_v15 = vsel %vm1477_vm10, %v1489_v8, 0.0 }
0x199a   :  { %1491 = vadd.xlane.f32.xlu0 %v1490_v15 }
0x19ca   :  { %v1624_v48 = vpop.f32.mrb[14].mxu0 }
0x1a27   :  { %v1492_v63 = vpop.xlane.xlu0 %1491 }
0x1a28   :  { %v1493_v4 = vadd.f32 1e-10, %v1492_v63 }
0x1a2a   :  { %2337 = vrcp.f32 %v1493_v4 }
0x1a34   :  { %v2338_v5 = vpop.eup %2337 }
0x1a35   :  { %v1495_v7 = vmul.f32 %v2338_v5, %v1489_v8 }
0x1a37   :  { %1498 = vperm.xlu1 %2240, %v1495_v7  }
0x1a3b   :  { %2261 = vset.pattern.permute.xlu1 %v2589_v9 }
0x1a3c   :  { %1504 = vperm.xlu1 %2261, %v1495_v7  }
0x1a40   :  { %2262 = vset.pattern.permute.xlu1 %v2590_v11 }
0x1a41   :  { %1510 = vperm.xlu1 %2262, %v1495_v7  }
0x1a45   :  { %2263 = vset.pattern.permute.xlu1 %v2591_v23 }
0x1a46   :  { %1516 = vperm.xlu1 %2263, %v1495_v7  }
0x1a4a   :  { %2264 = vset.pattern.permute.xlu1 %v2592_v13 }
0x1a4b   :  { %1522 = vperm.xlu1 %2264, %v1495_v7  }
0x1a4f   :  { %2265 = vset.pattern.permute.xlu1 %v2593_v17 }
0x1a50   :  { %1528 = vperm.xlu1 %2265, %v1495_v7  }
0x1a54   :  { %2266 = vset.pattern.permute.xlu1 %v2594_v1 }
0x1a55   :  { %1534 = vperm.xlu1 %2266, %v1495_v7  }
0x1a59   :  { %2267 = vset.pattern.permute.xlu1 %v2588_v55 }
0x1a5a   :  { %1540 = vperm.xlu1 %2267, %v1495_v7  }
0x1ab6   :  { %v1499_v30 = vpop.permute.xlu1 %1498 }
0x1ab7   :  { %v1501_v36 = vmul.f32 %v1499_v30, %v2872_v51 }
0x1abb   :  { %v1505_v26 = vpop.permute.xlu1 %1504 }
0x1abc   :  { %v1507_v33 = vmul.f32 %v1505_v26, %v2898_v14 }
0x1abe   :  { %v1508_v41 = vadd.f32 %v1507_v33, %v1501_v36 }
0x1ac0   :  { %v1511_v31 = vpop.permute.xlu1 %1510 }
0x1ac1   :  { %v1513_v37 = vmul.f32 %v1511_v31, %v2959_v54 }
0x1ac3   :  { %v1514_v0 = vadd.f32 %v1513_v37, %v1508_v41 }
0x1ac5   :  { %v1517_v39 = vpop.permute.xlu1 %1516 }
0x1ac6   :  { %v1519_v32 = vmul.f32 %v1517_v39, %v2997_v34  ;;  %v2115_v34 = vpop.f32.mrb[15].mxu0 }
0x1ac7   :  { %v1702_v49 = vpop.f32.mrb[16].mxu0 }
0x1ac8   :  { %v1520_v2 = vadd.f32 %v1519_v32, %v1514_v0  ;;  %v1703_v35 = vadd.f32 %v1702_v49, %v1624_v48 }
0x1aca   :  { %v1523_v44 = vpop.permute.xlu1 %1522 }
0x1acb   :  { %v1525_v3 = vmul.f32 %v1523_v44, %v3016_v6  ;;  %v2122_v6 = vpop.f32.mrb[17].mxu0 }
0x1acd   :  { %v1526_v47 = vadd.f32 %v1525_v3, %v1520_v2 }
0x1acf   :  { %v1529_v28 = vpop.permute.xlu1 %1528 }
0x1ad0   :  { %v1531_v42 = vmul.f32 %v1529_v28, %v3040_v38 }
0x1ad2   :  { %v1532_v45 = vadd.f32 %v1531_v42, %v1526_v47 }
0x1ad4   :  { %v1535_v40 = vpop.permute.xlu1 %1534 }
0x1ad5   :  { %v1537_v43 = vmul.f32 %v1535_v40, %v3072_v20 }
0x1ad7   :  { %v1538_v46 = vadd.f32 %v1537_v43, %v1532_v45 }
0x1ad9   :  { %v1541_v14 = vpop.permute.xlu1 %1540 }
0x1ada   :  { %v1543_v51 = vmul.f32 %v1541_v14, %v3091_v12 }
0x1adc   :  { %v1544_v54 = vadd.f32 %v1543_v51, %v1538_v46 }
0x1ade   :  { %1711 = vrot.lane.b32.xlu0 %v1544_v54, %s2587_s4  ;;  %s2495_s4 = scalar_lea.vmem %s1821_s27, 128 }
0x1adf   :  { %p2496_p0 = scmp.ne.s32.totalorder %s1821_s27, %s2495_s4  ;;  %p2501_p2 = scmp.lt.s32.totalorder %s2495_s4, %s2495_s4 }
0x1ae1   :  { %p2502_p3 = por %p2501_p2, %p2500_p1 }
0x1ae3   :  { %p2503_p4 = pnand %p2502_p3, %p2496_p0 }
0x1b50   :  { %v1712_v56 = vpop.permute.xlu0 %1711 }
0x1b51   :  { %2132 = vmatmul.mubr.msk.f32.vlgmr.msra.gmra.mrb[18].mxu0 %vm359_vm5, %v1712_v56 }
0x1c24   :  { %v1781_v38 = vpop.f32.mrb[18].mxu0 }
0x1c25   :  { %v1785_v20 = vadd.f32 %v1781_v38, %v1703_v35  ;;  %v2133_v58 = vpop.f32.mrb[19].mxu0 }
0x1c27   :  { %v1793_v59 = vadd.f32 %v1899_v57, %v1785_v20 }
0x1c29   :  { %2339 = vtanh.f32 %v1793_v59  ;;  %1797 = vrot.lane.b32.xlu1 %v1793_v59, %s2597_s18  ;;  %1795 = vst.msk [vmem:[#allocation16] sm:$0xff] %vm1794_vm0, %v1793_v59 }
0x1c2a   :  { %2506 = shalt.err (!%p2503_p4)
}
0x1c2b   :  { %s2507_s22 = scalar_lea.hbm %s3239_s16, 128 }
0x1c2c   :  { %p2508_p5 = scmp.ne.s32.totalorder %s3239_s16, %s2507_s22  ;;  %p2511_p6 = scmp.lt.u32.totalorder %s2507_s22, %s3239_s16 }
0x1c2e   :  { %p2513_p7 = pnand %p2511_p6, %p2508_p5 }
0x1c30   :  { %2516 = shalt.err (!%p2513_p7)
}
0x1c31   :  { %1823 = dma.vmem_to_hbm [thread:$0]  %s1821_s27, 128, %s3239_s16, [#allocation17]  }
0x1c32   :  { %s2598_s6 = smov [#allocation15]  }
0x1c33   :  { %s1810_s24 = sshll.u32 %s2598_s6, 4  ;;  %v2340_v12 = vpop.eup %2339  ;;  %s1811_s24 = int_to_ptr.vmem [resolvable:$true] %s1810_s24 }
0x1c34   :  { %v1802_v60 = vmul.f32 5.0, %v2340_v12  ;;  %s2517_s30 = scalar_lea.vmem %s1811_s24, 128  ;;  %p2522_p9 = scmp.lt.s32.totalorder %s1811_s24, %s1811_s24 }
0x1c35   :  { %p2518_p8 = scmp.ne.s32.totalorder %s1811_s24, %s2517_s30  ;;  %p2523_p10 = scmp.lt.s32.totalorder %s2517_s30, %s2517_s30 }
0x1c36   :  { %1803 = vst.msk [vmem:[#allocation15] sm:$0xff] %vm1794_vm0, %v1802_v60 }
0x1c37   :  { %p2524_p11 = por %p2523_p10, %p2522_p9 }
0x1c39   :  { %p2525_p12 = pnand %p2524_p11, %p2518_p8 }
0x1c3b   :  { %2528 = shalt.err (!%p2525_p12)
}
0x1c3c   :  { %s2529_s12 = scalar_lea.hbm %s3238_s15, 128 }
0x1c3d   :  { %p2530_p13 = scmp.ne.s32.totalorder %s3238_s15, %s2529_s12  ;;  %p2533_p0 = scmp.lt.u32.totalorder %s2529_s12, %s3238_s15 }
0x1c3f   :  { %p2535_p1 = pnand %p2533_p0, %p2530_p13 }
0x1c41   :  { %2538 = shalt.err (!%p2535_p1)
}
0x1c42   :  { %1813 = dma.vmem_to_hbm [thread:$0]  %s1811_s24, 128, %s3238_s15, [#allocation5]  }
0x1c43   :  { %s2599_s0 = smov [#allocation18]  }
0x1c44   :  { %s1830_s13 = sshll.u32 %s2599_s0, 4  ;;  %s1831_s13 = int_to_ptr.vmem [resolvable:$true] %s1830_s13 }
0x1c45   :  { %s2539_s3 = scalar_lea.vmem %s1831_s13, 128  ;;  %p2544_p3 = scmp.lt.s32.totalorder %s1831_s13, %s1831_s13 }
0x1c46   :  { %p2540_p2 = scmp.ne.s32.totalorder %s1831_s13, %s2539_s3  ;;  %p2545_p4 = scmp.lt.s32.totalorder %s2539_s3, %s2539_s3 }
0x1c48   :  { %p2546_p5 = por %p2545_p4, %p2544_p3 }
0x1c4a   :  { %p2547_p6 = pnand %p2546_p5, %p2540_p2 }
0x1c9b   :  { %v1798_v50 = vpop.permute.xlu1 %1797 }
0x1c9c   :  { %1800 = vst.msk [vmem:[#allocation18] sm:$0xff] %vm1794_vm0, %v1798_v50 }
0x1c9d   :  { %2550 = shalt.err (!%p2547_p6)
}
0x1c9e   :  { %s2551_s27 = scalar_lea.hbm %s3240_s17, 128 }
0x1c9f   :  { %p2552_p7 = scmp.ne.s32.totalorder %s3240_s17, %s2551_s27  ;;  %p2555_p8 = scmp.lt.u32.totalorder %s2551_s27, %s3240_s17 }
0x1ca1   :  { %p2557_p9 = pnand %p2555_p8, %p2552_p7 }
0x1ca3   :  { %2560 = shalt.err (!%p2557_p9)
}
0x1ca4   :  { %1833 = dma.vmem_to_hbm [thread:$0]  %s1831_s13, 128, %s3240_s17, [#allocation17]  }
0x1ca5   :  { %2569 = dma.done.wait [#allocation5], 128  }
0x1ca6   :  { %2570 = vsyncadd [#allocation5], 4294967168 }
0x1ca7   :  { %2571 = dma.done.wait [#allocation17], 256  }
0x1ca8   :  { %2572 = vsyncadd [#allocation17], 4294967040 }
0x1ca9   :  { %1843 = vsyncpa [#allocation4], 1 }
0x1caa   :  { %1844 = vsyncpa [#allocation7], 1 }
0x1cab   :  { %1845 = vsyncpa [#allocation10], 1 }
0x1cac   :  { %1846 = vsyncpa [#allocation13], 1 }
0x1cad   :  { %1847 = vsyncpa [#allocation5], 1 }
0x1cae   :  { %1848 = vsyncpa [#allocation17], 1 }

</bundles_post_ra>
